<compile_context>
chip_gen: v5e
topology: v5e:2x2
jax: 0.10.0
libtpu: 0.0.40
codegen_flags: <defaults>
</compile_context>

<pallas_src>
import functools
import math

import jax
import jax.numpy as jnp
from jax.experimental import pallas as pl
from jax.experimental.pallas import tpu as pltpu

NEG_SLOPE = 0.2
LN_EPS = 1e-5


def _vmem_spec():
    return pl.BlockSpec(memory_space=pltpu.MemorySpace.VMEM)


# ----------------------------------------------------------------------------
# Fused 3-layer GNNStack kernel
# ----------------------------------------------------------------------------
def _gnn_stack_kernel(x_ref, src_oh_ref, tgt_oh_ref, tgt_ohT_ref, ea_ref,
                      w_ref, ai_ref, aj_ref, ae_ref, eux_ref, eue_ref,
                      bias_ref, gamma_ref, beta_ref, rep_ref, mean_ref,
                      out_ref, *, heads, num_layers):
    f32 = jnp.float32
    src_oh = src_oh_ref[...]        # [E', N]   one-hot of edge sources
    tgt_oh = tgt_oh_ref[...]        # [E', N]   one-hot of edge targets
    tgt_ohT = tgt_ohT_ref[...]      # [N, E']   pre-transposed scatter matrix
    ea = ea_ref[...]                # [E', De]  edge attrs (zeros on self-loops)
    rep_mat = rep_ref[...]          # [H, H*C]  per-head column replicator
    mean_mat = mean_ref[...]        # [H*C, C]  head-mean folding matrix

    # layer/head invariant hoists
    tgt_mask = tgt_oh > 0.5         # [E', N]
    neg_fill = f32(-1e30)
    inv_h = f32(1.0 / heads)

    x = x_ref[...]                  # [N, C]
    emb = x
    for l in range(num_layers):
        w = w_ref[l]                # [C, H*C]
        a_i = ai_ref[l]             # [H*C, H]  block-diag att (target part)
        a_j = aj_ref[l]             # [H*C, H]  block-diag att (source part)
        a_e = ae_ref[l]             # [De, H]   att (edge part)
        eux = eux_ref[l]            # [C, C]
        eue = eue_ref[l]            # [De, C]
        bias = bias_ref[l]          # [1, C]

        xw = jnp.dot(x, w, preferred_element_type=f32)              # [N, H*C]
        s_i = jnp.dot(xw, a_i, preferred_element_type=f32)          # [N, H]
        s_j = jnp.dot(xw, a_j, preferred_element_type=f32)          # [N, H]
        x_j = jnp.dot(src_oh, xw, preferred_element_type=f32)       # [E', H*C]

        # attention logits for all heads at once
        alpha = (jnp.dot(tgt_oh, s_i, preferred_element_type=f32)
                 + jnp.dot(src_oh, s_j, preferred_element_type=f32)
                 + jnp.dot(ea, a_e, preferred_element_type=f32))    # [E', H]
        alpha = jnp.where(alpha > 0, alpha, NEG_SLOPE * alpha)      # leaky_relu

        # segment softmax over target nodes (self-loops guarantee coverage)
        m_rows = jnp.concatenate(
            [jnp.max(jnp.where(tgt_mask, alpha[:, h:h + 1], neg_fill),
                     axis=0, keepdims=True) for h in range(heads)],
            axis=0)                                                 # [H, N]
        # gather per-node max back to edges: contract lane axes (no transpose)
        m_edge = jax.lax.dot_general(tgt_oh, m_rows, (((1,), (1,)), ((), ())),
                                     preferred_element_type=f32)    # [E', H]
        e_alpha = jnp.exp(alpha - m_edge)                           # [E', H]
        d_node = jnp.dot(tgt_ohT, e_alpha, preferred_element_type=f32)  # [N, H]
        d_edge = jnp.dot(tgt_oh, d_node, preferred_element_type=f32)    # [E', H]
        alpha_n = e_alpha * pl.reciprocal(d_edge + 1e-16, approx=True)  # [E', H]

        # weighted messages, scatter-add and head mean — all MXU
        alpha_exp = jnp.dot(alpha_n, rep_mat, preferred_element_type=f32)      # [E', H*C]
        acc_x = jnp.dot(tgt_ohT, x_j * alpha_exp, preferred_element_type=f32)  # [N, H*C]
        mean_x = jnp.dot(acc_x, mean_mat, preferred_element_type=f32)          # [N, C]
        a_sum = jnp.sum(alpha_n, axis=-1, keepdims=True) * inv_h               # [E', 1]
        mean_e = jnp.dot(tgt_ohT, ea * a_sum, preferred_element_type=f32)      # [N, De]

        # update(): [mean_x || mean_e] @ edge_updates + bias (split matmul)
        out = (jnp.dot(mean_x, eux, preferred_element_type=f32)
               + jnp.dot(mean_e, eue, preferred_element_type=f32) + bias)      # [N, C]

        emb = out
        x = jnp.maximum(out, 0.0)           # ReLU; dropout(p=0.5) identity in eval
        if l < num_layers - 1:              # LayerNorm after layers 0 and 1 only
            mu = jnp.mean(x, axis=-1, keepdims=True)
            var = jnp.mean((x - mu) ** 2, axis=-1, keepdims=True)
            x = (x - mu) * jax.lax.rsqrt(var + LN_EPS) * gamma_ref[l] + beta_ref[l]

    # single (lane-denser) store: [relu(final) || emb]
    out_ref[...] = jnp.concatenate([x, emb], axis=-1)               # [N, 2C]


# ----------------------------------------------------------------------------
# Wrapper: densify graph structure, pre-fold params, one pallas_call
# ----------------------------------------------------------------------------
def _prep_params(params, heads, out_ch):
    eye_h = jnp.eye(heads, dtype=jnp.float32)
    w_s, ai_s, aj_s, ae_s, eux_s, eue_s, b_s = [], [], [], [], [], [], []
    for p in params["gat"]:
        att = p["att"]                                   # [H, 2C+De]
        a_i = att[:, :out_ch]
        a_j = att[:, out_ch:2 * out_ch]
        a_e = att[:, 2 * out_ch:]
        # block-diagonal per-head attention: [H*C, H]
        ai_s.append((a_i[:, :, None] * eye_h[:, None, :]).reshape(-1, heads))
        aj_s.append((a_j[:, :, None] * eye_h[:, None, :]).reshape(-1, heads))
        ae_s.append(a_e.T)                               # [De, H]
        w_s.append(p["weight"])
        eux_s.append(p["edge_updates"][:out_ch])         # [C, C]
        eue_s.append(p["edge_updates"][out_ch:])         # [De, C]
        b_s.append(p["bias"])                            # [1, C]
    gam = jnp.stack([ln["gamma"] for ln in params["ln"]])
    bet = jnp.stack([ln["beta"] for ln in params["ln"]])
    rep_mat = jnp.kron(eye_h, jnp.ones((1, out_ch), jnp.float32))          # [H, H*C]
    mean_mat = jnp.kron(jnp.ones((heads, 1), jnp.float32),
                        jnp.eye(out_ch, dtype=jnp.float32)) / heads        # [H*C, C]
    return (jnp.stack(w_s), jnp.stack(ai_s), jnp.stack(aj_s), jnp.stack(ae_s),
            jnp.stack(eux_s), jnp.stack(eue_s), jnp.stack(b_s),
            gam, bet, rep_mat, mean_mat)


def gnn_stack_forward(x, edge_index, edge_attr, batch, params,
                      *, heads, out_ch, edge_dim):
    del batch  # TODO(synk): global_mean_pool(x, batch) is computed but never
    #                        returned by the reference forward; omitted.
    n_nodes = x.shape[0]
    assert x.shape[1] == out_ch, "stack requires in_channels == out_channels"

    src, dst = edge_index[0], edge_index[1]
    loops = jnp.arange(n_nodes, dtype=src.dtype)
    src_full = jnp.concatenate([src, loops])             # add_self_loops
    dst_full = jnp.concatenate([dst, loops])
    ea_full = jnp.concatenate(
        [edge_attr, jnp.zeros((n_nodes, edge_dim), edge_attr.dtype)], axis=0)
    src_oh = jax.nn.one_hot(src_full, n_nodes, dtype=jnp.float32)   # [E', N]
    tgt_oh = jax.nn.one_hot(dst_full, n_nodes, dtype=jnp.float32)   # [E', N]
    tgt_ohT = tgt_oh.T                                              # [N, E']

    (w_s, ai_s, aj_s, ae_s, eux_s, eue_s, b_s,
     gam_s, bet_s, rep_mat, mean_mat) = _prep_params(params, heads, out_ch)

    num_layers = len(params["gat"])
    inputs = (x, src_oh, tgt_oh, tgt_ohT, ea_full,
              w_s, ai_s, aj_s, ae_s, eux_s, eue_s, b_s,
              gam_s, bet_s, rep_mat, mean_mat)

    total_bytes = sum(int(a.size) * a.dtype.itemsize for a in inputs)
    total_bytes += n_nodes * 2 * out_ch * 4
    vmem_limit = int(min(48 * 2 ** 20, max(8 * 2 ** 20, 2 * total_bytes)))

    kernel = functools.partial(_gnn_stack_kernel, heads=heads,
                               num_layers=num_layers)
    slab = pl.pallas_call(
        kernel,
        out_shape=jax.ShapeDtypeStruct((n_nodes, 2 * out_ch), jnp.float32),
        in_specs=[_vmem_spec()] * len(inputs),
        out_specs=_vmem_spec(),
        compiler_params=pltpu.CompilerParams(vmem_limit_bytes=vmem_limit),
    )(*inputs)
    return slab[:, :out_ch], slab[:, out_ch:]   # (x after ReLU, emb)


# ----------------------------------------------------------------------------
# Parameter init (glorot uniform, as in reset_parameters)
# ----------------------------------------------------------------------------
def _glorot(key, shape, fan_in, fan_out):
    stdv = math.sqrt(6.0 / (fan_in + fan_out))
    return jax.random.uniform(key, shape, jnp.float32, -stdv, stdv)


def init_params(key, in_ch, out_ch, edge_dim, heads, num_layers=3):
    keys = jax.random.split(key, 3 * num_layers)
    gat, ln = [], []
    for l in range(num_layers):
        w = _glorot(keys[3 * l + 0], (in_ch, heads * out_ch),
                    in_ch, heads * out_ch)
        att = _glorot(keys[3 * l + 1], (heads, 2 * out_ch + edge_dim),
                      heads, 2 * out_ch + edge_dim)
        eu = _glorot(keys[3 * l + 2], (out_ch + edge_dim, out_ch),
                     out_ch + edge_dim, out_ch)
        bias = jnp.zeros((1, out_ch), jnp.float32)
        gat.append(dict(weight=w, att=att, edge_updates=eu, bias=bias))
    for _ in range(2):
        ln.append(dict(gamma=jnp.ones((1, out_ch), jnp.float32),
                       beta=jnp.zeros((1, out_ch), jnp.float32)))
    return dict(gat=gat, ln=ln)


# ----------------------------------------------------------------------------
# Pure-JAX reference (sparse segment ops) for verification
# ----------------------------------------------------------------------------
def _gat_layer_ref(x, p, src, dst, edge_attr, heads, out_ch, edge_dim):
    n = x.shape[0]
    xw = x @ p["weight"]
    xh = xw.reshape(n, heads, out_ch)
    loops = jnp.arange(n, dtype=src.dtype)
    s = jnp.concatenate([src, loops])
    t = jnp.concatenate([dst, loops])
    ea = jnp.concatenate([edge_attr, jnp.zeros((n, edge_dim), edge_attr.dtype)], 0)
    x_j = xh[s]
    x_i = xh[t]
    ea_rep = jnp.broadcast_to(ea[:, None, :], (ea.shape[0], heads, edge_dim))
    cat = jnp.concatenate([x_i, x_j, ea_rep], axis=-1)
    alpha = (cat * p["att"][None]).sum(-1)
    alpha = jnp.where(alpha > 0, alpha, NEG_SLOPE * alpha)
    amax = jax.ops.segment_max(alpha, t, num_segments=n)
    ex = jnp.exp(alpha - amax[t])
    den = jax.ops.segment_sum(ex, t, num_segments=n)
    alpha = ex / (den[t] + 1e-16)
    msg = jnp.concatenate([x_j, ea_rep], axis=-1) * alpha[..., None]
    agg = jax.ops.segment_sum(msg, t, num_segments=n)
    return agg.mean(axis=1) @ p["edge_updates"] + p["bias"][0]


def _forward_ref(x, edge_index, edge_attr, params, heads, out_ch, edge_dim):
    src, dst = edge_index[0], edge_index[1]
    emb = x
    for i in range(3):
        x = _gat_layer_ref(x, params["gat"][i], src, dst, edge_attr,
                           heads, out_ch, edge_dim)
        emb = x
        x = jnp.maximum(x, 0.0)
        if i != 2:
            mu = x.mean(-1, keepdims=True)
            var = ((x - mu) ** 2).mean(-1, keepdims=True)
            x = ((x - mu) / jnp.sqrt(var + LN_EPS)
                 * params["ln"][i]["gamma"] + params["ln"][i]["beta"])
    return x, emb


# ----------------------------------------------------------------------------
if __name__ == "__main__":
    N, C, DE, H, E = 8, 32, 4, 2, 24   # in_channels == out_channels == 32

    key = jax.random.PRNGKey(0)
    k_x, k_s, k_d, k_ea, k_p = jax.random.split(key, 5)
    x = jax.random.normal(k_x, (N, C), jnp.float32)
    src = jax.random.randint(k_s, (E,), 0, N, dtype=jnp.int32)
    dst = jax.random.randint(k_d, (E,), 0, N, dtype=jnp.int32)
    edge_index = jnp.stack([src, dst], axis=0)          # [2, E]
    edge_attr = jax.random.normal(k_ea, (E, DE), jnp.float32)
    batch = jnp.zeros((N,), jnp.int32)

    params = init_params(k_p, C, C, DE, H)

    out, emb = gnn_stack_forward(x, edge_index, edge_attr, batch, params,
                                 heads=H, out_ch=C, edge_dim=DE)
    out, emb = jax.block_until_ready((out, emb))

    ref_out, ref_emb = _forward_ref(x, edge_index, edge_attr, params, H, C, DE)
    # tolerance loosened slightly vs f32 reference because of the EUP
    # approximate reciprocal in the softmax denominator.
    assert jnp.allclose(out, ref_out, rtol=5e-3, atol=5e-3), "output mismatch"
    assert jnp.allclose(emb, ref_emb, rtol=5e-3, atol=5e-3), "emb mismatch"

    print("KERNEL_OK")
</pallas_src>

<mosaic_0001>
module attributes {stable_mosaic.version = 11 : i64} {
  func.func @_gnn_stack_kernel(%arg0: memref<8x32xf32, #tpu.memory_space<vmem>>, %arg1: memref<32x8xf32, #tpu.memory_space<vmem>>, %arg2: memref<32x8xf32, #tpu.memory_space<vmem>>, %arg3: memref<8x32xf32, #tpu.memory_space<vmem>>, %arg4: memref<32x4xf32, #tpu.memory_space<vmem>>, %arg5: memref<3x32x64xf32, #tpu.memory_space<vmem>>, %arg6: memref<3x64x2xf32, #tpu.memory_space<vmem>>, %arg7: memref<3x64x2xf32, #tpu.memory_space<vmem>>, %arg8: memref<3x4x2xf32, #tpu.memory_space<vmem>>, %arg9: memref<3x32x32xf32, #tpu.memory_space<vmem>>, %arg10: memref<3x4x32xf32, #tpu.memory_space<vmem>>, %arg11: memref<3x1x32xf32, #tpu.memory_space<vmem>>, %arg12: memref<2x1x32xf32, #tpu.memory_space<vmem>>, %arg13: memref<2x1x32xf32, #tpu.memory_space<vmem>>, %arg14: memref<2x64xf32, #tpu.memory_space<vmem>>, %arg15: memref<64x32xf32, #tpu.memory_space<vmem>>, %arg16: memref<8x64xf32, #tpu.memory_space<vmem>>) attributes {dimension_semantics = [], scalar_prefetch = 0 : i64, scratch_operands = 0 : i64, tpu.core_type = #tpu.core_type<tc>} {
    %c0 = arith.constant 0 : index
    %c0_0 = arith.constant 0 : index
    %0 = vector.load %arg1[%c0, %c0_0] : memref<32x8xf32, #tpu.memory_space<vmem>>, vector<32x8xf32>
    %c0_1 = arith.constant 0 : index
    %c0_2 = arith.constant 0 : index
    %1 = vector.load %arg2[%c0_1, %c0_2] : memref<32x8xf32, #tpu.memory_space<vmem>>, vector<32x8xf32>
    %c0_3 = arith.constant 0 : index
    %c0_4 = arith.constant 0 : index
    %2 = vector.load %arg3[%c0_3, %c0_4] : memref<8x32xf32, #tpu.memory_space<vmem>>, vector<8x32xf32>
    %c0_5 = arith.constant 0 : index
    %c0_6 = arith.constant 0 : index
    %3 = vector.load %arg4[%c0_5, %c0_6] : memref<32x4xf32, #tpu.memory_space<vmem>>, vector<32x4xf32>
    %c0_7 = arith.constant 0 : index
    %c0_8 = arith.constant 0 : index
    %4 = vector.load %arg14[%c0_7, %c0_8] : memref<2x64xf32, #tpu.memory_space<vmem>>, vector<2x64xf32>
    %c0_9 = arith.constant 0 : index
    %c0_10 = arith.constant 0 : index
    %5 = vector.load %arg15[%c0_9, %c0_10] : memref<64x32xf32, #tpu.memory_space<vmem>>, vector<64x32xf32>
    %cst = arith.constant 5.000000e-01 : f32
    %6 = vector.broadcast %cst : f32 to vector<32x8xf32>
    %7 = arith.cmpf ogt, %1, %6 : vector<32x8xf32>
    %c0_11 = arith.constant 0 : index
    %c0_12 = arith.constant 0 : index
    %8 = vector.load %arg0[%c0_11, %c0_12] : memref<8x32xf32, #tpu.memory_space<vmem>>, vector<8x32xf32>
    %c0_13 = arith.constant 0 : index
    %c0_14 = arith.constant 0 : index
    %c0_15 = arith.constant 0 : index
    %9 = vector.load %arg5[%c0_13, %c0_14, %c0_15] : memref<3x32x64xf32, #tpu.memory_space<vmem>>, vector<1x32x64xf32>
    %10 = vector.shape_cast %9 : vector<1x32x64xf32> to vector<32x64xf32>
    %c0_16 = arith.constant 0 : index
    %c0_17 = arith.constant 0 : index
    %c0_18 = arith.constant 0 : index
    %11 = vector.load %arg6[%c0_16, %c0_17, %c0_18] : memref<3x64x2xf32, #tpu.memory_space<vmem>>, vector<1x64x2xf32>
    %12 = vector.shape_cast %11 : vector<1x64x2xf32> to vector<64x2xf32>
    %c0_19 = arith.constant 0 : index
    %c0_20 = arith.constant 0 : index
    %c0_21 = arith.constant 0 : index
    %13 = vector.load %arg7[%c0_19, %c0_20, %c0_21] : memref<3x64x2xf32, #tpu.memory_space<vmem>>, vector<1x64x2xf32>
    %14 = vector.shape_cast %13 : vector<1x64x2xf32> to vector<64x2xf32>
    %c0_22 = arith.constant 0 : index
    %c0_23 = arith.constant 0 : index
    %c0_24 = arith.constant 0 : index
    %15 = vector.load %arg8[%c0_22, %c0_23, %c0_24] : memref<3x4x2xf32, #tpu.memory_space<vmem>>, vector<1x4x2xf32>
    %16 = vector.shape_cast %15 : vector<1x4x2xf32> to vector<4x2xf32>
    %c0_25 = arith.constant 0 : index
    %c0_26 = arith.constant 0 : index
    %c0_27 = arith.constant 0 : index
    %17 = vector.load %arg9[%c0_25, %c0_26, %c0_27] : memref<3x32x32xf32, #tpu.memory_space<vmem>>, vector<1x32x32xf32>
    %18 = vector.shape_cast %17 : vector<1x32x32xf32> to vector<32x32xf32>
    %c0_28 = arith.constant 0 : index
    %c0_29 = arith.constant 0 : index
    %c0_30 = arith.constant 0 : index
    %19 = vector.load %arg10[%c0_28, %c0_29, %c0_30] : memref<3x4x32xf32, #tpu.memory_space<vmem>>, vector<1x4x32xf32>
    %20 = vector.shape_cast %19 : vector<1x4x32xf32> to vector<4x32xf32>
    %c0_31 = arith.constant 0 : index
    %c0_32 = arith.constant 0 : index
    %c0_33 = arith.constant 0 : index
    %21 = vector.load %arg11[%c0_31, %c0_32, %c0_33] : memref<3x1x32xf32, #tpu.memory_space<vmem>>, vector<1x1x32xf32>
    %22 = vector.shape_cast %21 : vector<1x1x32xf32> to vector<1x32xf32>
    %cst_34 = arith.constant dense<0.000000e+00> : vector<8x64xf32>
    %23 = tpu.matmul %8, %10, %cst_34 {dimension_numbers = #tpu.dot_dimension_numbers<[1], [0], [0], [1], [0, 0, 1, 1], [], []>} : vector<8x32xf32>, vector<32x64xf32>, vector<8x64xf32> -> vector<8x64xf32>
    %cst_35 = arith.constant dense<0.000000e+00> : vector<8x2xf32>
    %24 = tpu.matmul %23, %12, %cst_35 {dimension_numbers = #tpu.dot_dimension_numbers<[1], [0], [0], [1], [0, 0, 1, 1], [], []>} : vector<8x64xf32>, vector<64x2xf32>, vector<8x2xf32> -> vector<8x2xf32>
    %cst_36 = arith.constant dense<0.000000e+00> : vector<8x2xf32>
    %25 = tpu.matmul %23, %14, %cst_36 {dimension_numbers = #tpu.dot_dimension_numbers<[1], [0], [0], [1], [0, 0, 1, 1], [], []>} : vector<8x64xf32>, vector<64x2xf32>, vector<8x2xf32> -> vector<8x2xf32>
    %cst_37 = arith.constant dense<0.000000e+00> : vector<32x64xf32>
    %26 = tpu.matmul %0, %23, %cst_37 {dimension_numbers = #tpu.dot_dimension_numbers<[1], [0], [0], [1], [0, 0, 1, 1], [], []>} : vector<32x8xf32>, vector<8x64xf32>, vector<32x64xf32> -> vector<32x64xf32>
    %cst_38 = arith.constant dense<0.000000e+00> : vector<32x2xf32>
    %27 = tpu.matmul %1, %24, %cst_38 {dimension_numbers = #tpu.dot_dimension_numbers<[1], [0], [0], [1], [0, 0, 1, 1], [], []>} : vector<32x8xf32>, vector<8x2xf32>, vector<32x2xf32> -> vector<32x2xf32>
    %cst_39 = arith.constant dense<0.000000e+00> : vector<32x2xf32>
    %28 = tpu.matmul %0, %25, %cst_39 {dimension_numbers = #tpu.dot_dimension_numbers<[1], [0], [0], [1], [0, 0, 1, 1], [], []>} : vector<32x8xf32>, vector<8x2xf32>, vector<32x2xf32> -> vector<32x2xf32>
    %29 = arith.addf %27, %28 : vector<32x2xf32>
    %cst_40 = arith.constant dense<0.000000e+00> : vector<32x2xf32>
    %30 = tpu.matmul %3, %16, %cst_40 {dimension_numbers = #tpu.dot_dimension_numbers<[1], [0], [0], [1], [0, 0, 1, 1], [], []>} : vector<32x4xf32>, vector<4x2xf32>, vector<32x2xf32> -> vector<32x2xf32>
    %31 = arith.addf %29, %30 : vector<32x2xf32>
    %cst_41 = arith.constant 0.000000e+00 : f32
    %32 = vector.broadcast %cst_41 : f32 to vector<32x2xf32>
    %33 = arith.cmpf ogt, %31, %32 : vector<32x2xf32>
    %cst_42 = arith.constant 2.000000e-01 : f32
    %34 = vector.broadcast %cst_42 : f32 to vector<32x2xf32>
    %35 = arith.mulf %34, %31 : vector<32x2xf32>
    %36 = arith.select %33, %31, %35 : vector<32x2xi1>, vector<32x2xf32>
    %37 = vector.extract_strided_slice %36 {offsets = [0, 0], sizes = [32, 1], strides = [1, 1]} : vector<32x2xf32> to vector<32x1xf32>
    %cst_43 = arith.constant -1.000000e+30 : f32
    %38 = vector.shape_cast %37 : vector<32x1xf32> to vector<32x1xf32>
    %39 = vector.broadcast %38 : vector<32x1xf32> to vector<32x8xf32>
    %40 = vector.broadcast %cst_43 : f32 to vector<32x8xf32>
    %41 = arith.select %7, %39, %40 : vector<32x8xi1>, vector<32x8xf32>
    %cst_44 = arith.constant dense<0xFF800000> : vector<8xf32>
    %42 = vector.multi_reduction <maximumf>, %41, %cst_44 [0] : vector<32x8xf32> to vector<8xf32>
    %43 = vector.shape_cast %42 : vector<8xf32> to vector<1x8xf32>
    %44 = vector.extract_strided_slice %36 {offsets = [0, 1], sizes = [32, 1], strides = [1, 1]} : vector<32x2xf32> to vector<32x1xf32>
    %cst_45 = arith.constant -1.000000e+30 : f32
    %45 = vector.shape_cast %44 : vector<32x1xf32> to vector<32x1xf32>
    %46 = vector.broadcast %45 : vector<32x1xf32> to vector<32x8xf32>
    %47 = vector.broadcast %cst_45 : f32 to vector<32x8xf32>
    %48 = arith.select %7, %46, %47 : vector<32x8xi1>, vector<32x8xf32>
    %cst_46 = arith.constant dense<0xFF800000> : vector<8xf32>
    %49 = vector.multi_reduction <maximumf>, %48, %cst_46 [0] : vector<32x8xf32> to vector<8xf32>
    %50 = vector.shape_cast %49 : vector<8xf32> to vector<1x8xf32>
    %51 = tpu.concatenate %43, %50 in 0 : vector<1x8xf32>, vector<1x8xf32> -> vector<2x8xf32>
    %cst_47 = arith.constant dense<0.000000e+00> : vector<32x2xf32>
    %52 = tpu.matmul %1, %51, %cst_47 {dimension_numbers = #tpu.dot_dimension_numbers<[1], [1], [0], [0], [0, 0, 1, 0], [], []>} : vector<32x8xf32>, vector<2x8xf32>, vector<32x2xf32> -> vector<32x2xf32>
    %53 = arith.subf %36, %52 : vector<32x2xf32>
    %54 = math.exp %53 : vector<32x2xf32>
    %cst_48 = arith.constant dense<0.000000e+00> : vector<8x2xf32>
    %55 = tpu.matmul %2, %54, %cst_48 {dimension_numbers = #tpu.dot_dimension_numbers<[1], [0], [0], [1], [0, 0, 1, 1], [], []>} : vector<8x32xf32>, vector<32x2xf32>, vector<8x2xf32> -> vector<8x2xf32>
    %cst_49 = arith.constant dense<0.000000e+00> : vector<32x2xf32>
    %56 = tpu.matmul %1, %55, %cst_49 {dimension_numbers = #tpu.dot_dimension_numbers<[1], [0], [0], [1], [0, 0, 1, 1], [], []>} : vector<32x8xf32>, vector<8x2xf32>, vector<32x2xf32> -> vector<32x2xf32>
    %cst_50 = arith.constant 1.000000e-16 : f32
    %57 = vector.broadcast %cst_50 : f32 to vector<32x2xf32>
    %58 = arith.addf %56, %57 : vector<32x2xf32>
    %59 = tpu.reciprocal %58 {approx = true} : vector<32x2xf32> -> vector<32x2xf32>
    %60 = arith.mulf %54, %59 : vector<32x2xf32>
    %cst_51 = arith.constant dense<0.000000e+00> : vector<32x64xf32>
    %61 = tpu.matmul %60, %4, %cst_51 {dimension_numbers = #tpu.dot_dimension_numbers<[1], [0], [0], [1], [0, 0, 1, 1], [], []>} : vector<32x2xf32>, vector<2x64xf32>, vector<32x64xf32> -> vector<32x64xf32>
    %62 = arith.mulf %26, %61 : vector<32x64xf32>
    %cst_52 = arith.constant dense<0.000000e+00> : vector<8x64xf32>
    %63 = tpu.matmul %2, %62, %cst_52 {dimension_numbers = #tpu.dot_dimension_numbers<[1], [0], [0], [1], [0, 0, 1, 1], [], []>} : vector<8x32xf32>, vector<32x64xf32>, vector<8x64xf32> -> vector<8x64xf32>
    %cst_53 = arith.constant dense<0.000000e+00> : vector<8x32xf32>
    %64 = tpu.matmul %63, %5, %cst_53 {dimension_numbers = #tpu.dot_dimension_numbers<[1], [0], [0], [1], [0, 0, 1, 1], [], []>} : vector<8x64xf32>, vector<64x32xf32>, vector<8x32xf32> -> vector<8x32xf32>
    %cst_54 = arith.constant dense<0.000000e+00> : vector<32xf32>
    %65 = vector.multi_reduction <add>, %60, %cst_54 [1] : vector<32x2xf32> to vector<32xf32>
    %66 = vector.shape_cast %65 : vector<32xf32> to vector<32x1xf32>
    %cst_55 = arith.constant 5.000000e-01 : f32
    %67 = vector.broadcast %cst_55 : f32 to vector<32x1xf32>
    %68 = arith.mulf %66, %67 : vector<32x1xf32>
    %69 = vector.broadcast %68 : vector<32x1xf32> to vector<32x4xf32>
    %70 = arith.mulf %3, %69 : vector<32x4xf32>
    %cst_56 = arith.constant dense<0.000000e+00> : vector<8x4xf32>
    %71 = tpu.matmul %2, %70, %cst_56 {dimension_numbers = #tpu.dot_dimension_numbers<[1], [0], [0], [1], [0, 0, 1, 1], [], []>} : vector<8x32xf32>, vector<32x4xf32>, vector<8x4xf32> -> vector<8x4xf32>
    %cst_57 = arith.constant dense<0.000000e+00> : vector<8x32xf32>
    %72 = tpu.matmul %64, %18, %cst_57 {dimension_numbers = #tpu.dot_dimension_numbers<[1], [0], [0], [1], [0, 0, 1, 1], [], []>} : vector<8x32xf32>, vector<32x32xf32>, vector<8x32xf32> -> vector<8x32xf32>
    %cst_58 = arith.constant dense<0.000000e+00> : vector<8x32xf32>
    %73 = tpu.matmul %71, %20, %cst_58 {dimension_numbers = #tpu.dot_dimension_numbers<[1], [0], [0], [1], [0, 0, 1, 1], [], []>} : vector<8x4xf32>, vector<4x32xf32>, vector<8x32xf32> -> vector<8x32xf32>
    %74 = arith.addf %72, %73 : vector<8x32xf32>
    %75 = vector.broadcast %22 : vector<1x32xf32> to vector<8x32xf32>
    %76 = arith.addf %74, %75 : vector<8x32xf32>
    %cst_59 = arith.constant 0.000000e+00 : f32
    %77 = vector.broadcast %cst_59 : f32 to vector<8x32xf32>
    %78 = arith.maximumf %76, %77 : vector<8x32xf32>
    %cst_60 = arith.constant dense<0.000000e+00> : vector<8xf32>
    %79 = vector.multi_reduction <add>, %78, %cst_60 [1] : vector<8x32xf32> to vector<8xf32>
    %80 = vector.shape_cast %79 : vector<8xf32> to vector<8x1xf32>
    %cst_61 = arith.constant 3.200000e+01 : f32
    %81 = vector.broadcast %cst_61 : f32 to vector<8x1xf32>
    %82 = arith.divf %80, %81 : vector<8x1xf32>
    %83 = vector.broadcast %82 : vector<8x1xf32> to vector<8x32xf32>
    %84 = arith.subf %78, %83 : vector<8x32xf32>
    %85 = arith.mulf %84, %84 : vector<8x32xf32>
    %cst_62 = arith.constant dense<0.000000e+00> : vector<8xf32>
    %86 = vector.multi_reduction <add>, %85, %cst_62 [1] : vector<8x32xf32> to vector<8xf32>
    %87 = vector.shape_cast %86 : vector<8xf32> to vector<8x1xf32>
    %cst_63 = arith.constant 3.200000e+01 : f32
    %88 = vector.broadcast %cst_63 : f32 to vector<8x1xf32>
    %89 = arith.divf %87, %88 : vector<8x1xf32>
    %90 = vector.broadcast %82 : vector<8x1xf32> to vector<8x32xf32>
    %91 = arith.subf %78, %90 : vector<8x32xf32>
    %cst_64 = arith.constant 9.99999974E-6 : f32
    %92 = vector.broadcast %cst_64 : f32 to vector<8x1xf32>
    %93 = arith.addf %89, %92 : vector<8x1xf32>
    %94 = math.rsqrt %93 : vector<8x1xf32>
    %95 = vector.broadcast %94 : vector<8x1xf32> to vector<8x32xf32>
    %96 = arith.mulf %91, %95 : vector<8x32xf32>
    %c0_65 = arith.constant 0 : index
    %c0_66 = arith.constant 0 : index
    %c0_67 = arith.constant 0 : index
    %97 = vector.load %arg12[%c0_65, %c0_66, %c0_67] : memref<2x1x32xf32, #tpu.memory_space<vmem>>, vector<1x1x32xf32>
    %98 = vector.shape_cast %97 : vector<1x1x32xf32> to vector<1x32xf32>
    %99 = vector.broadcast %98 : vector<1x32xf32> to vector<8x32xf32>
    %100 = arith.mulf %96, %99 : vector<8x32xf32>
    %c0_68 = arith.constant 0 : index
    %c0_69 = arith.constant 0 : index
    %c0_70 = arith.constant 0 : index
    %101 = vector.load %arg13[%c0_68, %c0_69, %c0_70] : memref<2x1x32xf32, #tpu.memory_space<vmem>>, vector<1x1x32xf32>
    %102 = vector.shape_cast %101 : vector<1x1x32xf32> to vector<1x32xf32>
    %103 = vector.broadcast %102 : vector<1x32xf32> to vector<8x32xf32>
    %104 = arith.addf %100, %103 : vector<8x32xf32>
    %c1 = arith.constant 1 : index
    %c0_71 = arith.constant 0 : index
    %c0_72 = arith.constant 0 : index
    %105 = vector.load %arg5[%c1, %c0_71, %c0_72] : memref<3x32x64xf32, #tpu.memory_space<vmem>>, vector<1x32x64xf32>
    %106 = vector.shape_cast %105 : vector<1x32x64xf32> to vector<32x64xf32>
    %c1_73 = arith.constant 1 : index
    %c0_74 = arith.constant 0 : index
    %c0_75 = arith.constant 0 : index
    %107 = vector.load %arg6[%c1_73, %c0_74, %c0_75] : memref<3x64x2xf32, #tpu.memory_space<vmem>>, vector<1x64x2xf32>
    %108 = vector.shape_cast %107 : vector<1x64x2xf32> to vector<64x2xf32>
    %c1_76 = arith.constant 1 : index
    %c0_77 = arith.constant 0 : index
    %c0_78 = arith.constant 0 : index
    %109 = vector.load %arg7[%c1_76, %c0_77, %c0_78] : memref<3x64x2xf32, #tpu.memory_space<vmem>>, vector<1x64x2xf32>
    %110 = vector.shape_cast %109 : vector<1x64x2xf32> to vector<64x2xf32>
    %c1_79 = arith.constant 1 : index
    %c0_80 = arith.constant 0 : index
    %c0_81 = arith.constant 0 : index
    %111 = vector.load %arg8[%c1_79, %c0_80, %c0_81] : memref<3x4x2xf32, #tpu.memory_space<vmem>>, vector<1x4x2xf32>
    %112 = vector.shape_cast %111 : vector<1x4x2xf32> to vector<4x2xf32>
    %c1_82 = arith.constant 1 : index
    %c0_83 = arith.constant 0 : index
    %c0_84 = arith.constant 0 : index
    %113 = vector.load %arg9[%c1_82, %c0_83, %c0_84] : memref<3x32x32xf32, #tpu.memory_space<vmem>>, vector<1x32x32xf32>
    %114 = vector.shape_cast %113 : vector<1x32x32xf32> to vector<32x32xf32>
    %c1_85 = arith.constant 1 : index
    %c0_86 = arith.constant 0 : index
    %c0_87 = arith.constant 0 : index
    %115 = vector.load %arg10[%c1_85, %c0_86, %c0_87] : memref<3x4x32xf32, #tpu.memory_space<vmem>>, vector<1x4x32xf32>
    %116 = vector.shape_cast %115 : vector<1x4x32xf32> to vector<4x32xf32>
    %c1_88 = arith.constant 1 : index
    %c0_89 = arith.constant 0 : index
    %c0_90 = arith.constant 0 : index
    %117 = vector.load %arg11[%c1_88, %c0_89, %c0_90] : memref<3x1x32xf32, #tpu.memory_space<vmem>>, vector<1x1x32xf32>
    %118 = vector.shape_cast %117 : vector<1x1x32xf32> to vector<1x32xf32>
    %cst_91 = arith.constant dense<0.000000e+00> : vector<8x64xf32>
    %119 = tpu.matmul %104, %106, %cst_91 {dimension_numbers = #tpu.dot_dimension_numbers<[1], [0], [0], [1], [0, 0, 1, 1], [], []>} : vector<8x32xf32>, vector<32x64xf32>, vector<8x64xf32> -> vector<8x64xf32>
    %cst_92 = arith.constant dense<0.000000e+00> : vector<8x2xf32>
    %120 = tpu.matmul %119, %108, %cst_92 {dimension_numbers = #tpu.dot_dimension_numbers<[1], [0], [0], [1], [0, 0, 1, 1], [], []>} : vector<8x64xf32>, vector<64x2xf32>, vector<8x2xf32> -> vector<8x2xf32>
    %cst_93 = arith.constant dense<0.000000e+00> : vector<8x2xf32>
    %121 = tpu.matmul %119, %110, %cst_93 {dimension_numbers = #tpu.dot_dimension_numbers<[1], [0], [0], [1], [0, 0, 1, 1], [], []>} : vector<8x64xf32>, vector<64x2xf32>, vector<8x2xf32> -> vector<8x2xf32>
    %cst_94 = arith.constant dense<0.000000e+00> : vector<32x64xf32>
    %122 = tpu.matmul %0, %119, %cst_94 {dimension_numbers = #tpu.dot_dimension_numbers<[1], [0], [0], [1], [0, 0, 1, 1], [], []>} : vector<32x8xf32>, vector<8x64xf32>, vector<32x64xf32> -> vector<32x64xf32>
    %cst_95 = arith.constant dense<0.000000e+00> : vector<32x2xf32>
    %123 = tpu.matmul %1, %120, %cst_95 {dimension_numbers = #tpu.dot_dimension_numbers<[1], [0], [0], [1], [0, 0, 1, 1], [], []>} : vector<32x8xf32>, vector<8x2xf32>, vector<32x2xf32> -> vector<32x2xf32>
    %cst_96 = arith.constant dense<0.000000e+00> : vector<32x2xf32>
    %124 = tpu.matmul %0, %121, %cst_96 {dimension_numbers = #tpu.dot_dimension_numbers<[1], [0], [0], [1], [0, 0, 1, 1], [], []>} : vector<32x8xf32>, vector<8x2xf32>, vector<32x2xf32> -> vector<32x2xf32>
    %125 = arith.addf %123, %124 : vector<32x2xf32>
    %cst_97 = arith.constant dense<0.000000e+00> : vector<32x2xf32>
    %126 = tpu.matmul %3, %112, %cst_97 {dimension_numbers = #tpu.dot_dimension_numbers<[1], [0], [0], [1], [0, 0, 1, 1], [], []>} : vector<32x4xf32>, vector<4x2xf32>, vector<32x2xf32> -> vector<32x2xf32>
    %127 = arith.addf %125, %126 : vector<32x2xf32>
    %cst_98 = arith.constant 0.000000e+00 : f32
    %128 = vector.broadcast %cst_98 : f32 to vector<32x2xf32>
    %129 = arith.cmpf ogt, %127, %128 : vector<32x2xf32>
    %cst_99 = arith.constant 2.000000e-01 : f32
    %130 = vector.broadcast %cst_99 : f32 to vector<32x2xf32>
    %131 = arith.mulf %130, %127 : vector<32x2xf32>
    %132 = arith.select %129, %127, %131 : vector<32x2xi1>, vector<32x2xf32>
    %133 = vector.extract_strided_slice %132 {offsets = [0, 0], sizes = [32, 1], strides = [1, 1]} : vector<32x2xf32> to vector<32x1xf32>
    %cst_100 = arith.constant -1.000000e+30 : f32
    %134 = vector.shape_cast %133 : vector<32x1xf32> to vector<32x1xf32>
    %135 = vector.broadcast %134 : vector<32x1xf32> to vector<32x8xf32>
    %136 = vector.broadcast %cst_100 : f32 to vector<32x8xf32>
    %137 = arith.select %7, %135, %136 : vector<32x8xi1>, vector<32x8xf32>
    %cst_101 = arith.constant dense<0xFF800000> : vector<8xf32>
    %138 = vector.multi_reduction <maximumf>, %137, %cst_101 [0] : vector<32x8xf32> to vector<8xf32>
    %139 = vector.shape_cast %138 : vector<8xf32> to vector<1x8xf32>
    %140 = vector.extract_strided_slice %132 {offsets = [0, 1], sizes = [32, 1], strides = [1, 1]} : vector<32x2xf32> to vector<32x1xf32>
    %cst_102 = arith.constant -1.000000e+30 : f32
    %141 = vector.shape_cast %140 : vector<32x1xf32> to vector<32x1xf32>
    %142 = vector.broadcast %141 : vector<32x1xf32> to vector<32x8xf32>
    %143 = vector.broadcast %cst_102 : f32 to vector<32x8xf32>
    %144 = arith.select %7, %142, %143 : vector<32x8xi1>, vector<32x8xf32>
    %cst_103 = arith.constant dense<0xFF800000> : vector<8xf32>
    %145 = vector.multi_reduction <maximumf>, %144, %cst_103 [0] : vector<32x8xf32> to vector<8xf32>
    %146 = vector.shape_cast %145 : vector<8xf32> to vector<1x8xf32>
    %147 = tpu.concatenate %139, %146 in 0 : vector<1x8xf32>, vector<1x8xf32> -> vector<2x8xf32>
    %cst_104 = arith.constant dense<0.000000e+00> : vector<32x2xf32>
    %148 = tpu.matmul %1, %147, %cst_104 {dimension_numbers = #tpu.dot_dimension_numbers<[1], [1], [0], [0], [0, 0, 1, 0], [], []>} : vector<32x8xf32>, vector<2x8xf32>, vector<32x2xf32> -> vector<32x2xf32>
    %149 = arith.subf %132, %148 : vector<32x2xf32>
    %150 = math.exp %149 : vector<32x2xf32>
    %cst_105 = arith.constant dense<0.000000e+00> : vector<8x2xf32>
    %151 = tpu.matmul %2, %150, %cst_105 {dimension_numbers = #tpu.dot_dimension_numbers<[1], [0], [0], [1], [0, 0, 1, 1], [], []>} : vector<8x32xf32>, vector<32x2xf32>, vector<8x2xf32> -> vector<8x2xf32>
    %cst_106 = arith.constant dense<0.000000e+00> : vector<32x2xf32>
    %152 = tpu.matmul %1, %151, %cst_106 {dimension_numbers = #tpu.dot_dimension_numbers<[1], [0], [0], [1], [0, 0, 1, 1], [], []>} : vector<32x8xf32>, vector<8x2xf32>, vector<32x2xf32> -> vector<32x2xf32>
    %cst_107 = arith.constant 1.000000e-16 : f32
    %153 = vector.broadcast %cst_107 : f32 to vector<32x2xf32>
    %154 = arith.addf %152, %153 : vector<32x2xf32>
    %155 = tpu.reciprocal %154 {approx = true} : vector<32x2xf32> -> vector<32x2xf32>
    %156 = arith.mulf %150, %155 : vector<32x2xf32>
    %cst_108 = arith.constant dense<0.000000e+00> : vector<32x64xf32>
    %157 = tpu.matmul %156, %4, %cst_108 {dimension_numbers = #tpu.dot_dimension_numbers<[1], [0], [0], [1], [0, 0, 1, 1], [], []>} : vector<32x2xf32>, vector<2x64xf32>, vector<32x64xf32> -> vector<32x64xf32>
    %158 = arith.mulf %122, %157 : vector<32x64xf32>
    %cst_109 = arith.constant dense<0.000000e+00> : vector<8x64xf32>
    %159 = tpu.matmul %2, %158, %cst_109 {dimension_numbers = #tpu.dot_dimension_numbers<[1], [0], [0], [1], [0, 0, 1, 1], [], []>} : vector<8x32xf32>, vector<32x64xf32>, vector<8x64xf32> -> vector<8x64xf32>
    %cst_110 = arith.constant dense<0.000000e+00> : vector<8x32xf32>
    %160 = tpu.matmul %159, %5, %cst_110 {dimension_numbers = #tpu.dot_dimension_numbers<[1], [0], [0], [1], [0, 0, 1, 1], [], []>} : vector<8x64xf32>, vector<64x32xf32>, vector<8x32xf32> -> vector<8x32xf32>
    %cst_111 = arith.constant dense<0.000000e+00> : vector<32xf32>
    %161 = vector.multi_reduction <add>, %156, %cst_111 [1] : vector<32x2xf32> to vector<32xf32>
    %162 = vector.shape_cast %161 : vector<32xf32> to vector<32x1xf32>
    %cst_112 = arith.constant 5.000000e-01 : f32
    %163 = vector.broadcast %cst_112 : f32 to vector<32x1xf32>
    %164 = arith.mulf %162, %163 : vector<32x1xf32>
    %165 = vector.broadcast %164 : vector<32x1xf32> to vector<32x4xf32>
    %166 = arith.mulf %3, %165 : vector<32x4xf32>
    %cst_113 = arith.constant dense<0.000000e+00> : vector<8x4xf32>
    %167 = tpu.matmul %2, %166, %cst_113 {dimension_numbers = #tpu.dot_dimension_numbers<[1], [0], [0], [1], [0, 0, 1, 1], [], []>} : vector<8x32xf32>, vector<32x4xf32>, vector<8x4xf32> -> vector<8x4xf32>
    %cst_114 = arith.constant dense<0.000000e+00> : vector<8x32xf32>
    %168 = tpu.matmul %160, %114, %cst_114 {dimension_numbers = #tpu.dot_dimension_numbers<[1], [0], [0], [1], [0, 0, 1, 1], [], []>} : vector<8x32xf32>, vector<32x32xf32>, vector<8x32xf32> -> vector<8x32xf32>
    %cst_115 = arith.constant dense<0.000000e+00> : vector<8x32xf32>
    %169 = tpu.matmul %167, %116, %cst_115 {dimension_numbers = #tpu.dot_dimension_numbers<[1], [0], [0], [1], [0, 0, 1, 1], [], []>} : vector<8x4xf32>, vector<4x32xf32>, vector<8x32xf32> -> vector<8x32xf32>
    %170 = arith.addf %168, %169 : vector<8x32xf32>
    %171 = vector.broadcast %118 : vector<1x32xf32> to vector<8x32xf32>
    %172 = arith.addf %170, %171 : vector<8x32xf32>
    %cst_116 = arith.constant 0.000000e+00 : f32
    %173 = vector.broadcast %cst_116 : f32 to vector<8x32xf32>
    %174 = arith.maximumf %172, %173 : vector<8x32xf32>
    %cst_117 = arith.constant dense<0.000000e+00> : vector<8xf32>
    %175 = vector.multi_reduction <add>, %174, %cst_117 [1] : vector<8x32xf32> to vector<8xf32>
    %176 = vector.shape_cast %175 : vector<8xf32> to vector<8x1xf32>
    %cst_118 = arith.constant 3.200000e+01 : f32
    %177 = vector.broadcast %cst_118 : f32 to vector<8x1xf32>
    %178 = arith.divf %176, %177 : vector<8x1xf32>
    %179 = vector.broadcast %178 : vector<8x1xf32> to vector<8x32xf32>
    %180 = arith.subf %174, %179 : vector<8x32xf32>
    %181 = arith.mulf %180, %180 : vector<8x32xf32>
    %cst_119 = arith.constant dense<0.000000e+00> : vector<8xf32>
    %182 = vector.multi_reduction <add>, %181, %cst_119 [1] : vector<8x32xf32> to vector<8xf32>
    %183 = vector.shape_cast %182 : vector<8xf32> to vector<8x1xf32>
    %cst_120 = arith.constant 3.200000e+01 : f32
    %184 = vector.broadcast %cst_120 : f32 to vector<8x1xf32>
    %185 = arith.divf %183, %184 : vector<8x1xf32>
    %186 = vector.broadcast %178 : vector<8x1xf32> to vector<8x32xf32>
    %187 = arith.subf %174, %186 : vector<8x32xf32>
    %cst_121 = arith.constant 9.99999974E-6 : f32
    %188 = vector.broadcast %cst_121 : f32 to vector<8x1xf32>
    %189 = arith.addf %185, %188 : vector<8x1xf32>
    %190 = math.rsqrt %189 : vector<8x1xf32>
    %191 = vector.broadcast %190 : vector<8x1xf32> to vector<8x32xf32>
    %192 = arith.mulf %187, %191 : vector<8x32xf32>
    %c1_122 = arith.constant 1 : index
    %c0_123 = arith.constant 0 : index
    %c0_124 = arith.constant 0 : index
    %193 = vector.load %arg12[%c1_122, %c0_123, %c0_124] : memref<2x1x32xf32, #tpu.memory_space<vmem>>, vector<1x1x32xf32>
    %194 = vector.shape_cast %193 : vector<1x1x32xf32> to vector<1x32xf32>
    %195 = vector.broadcast %194 : vector<1x32xf32> to vector<8x32xf32>
    %196 = arith.mulf %192, %195 : vector<8x32xf32>
    %c1_125 = arith.constant 1 : index
    %c0_126 = arith.constant 0 : index
    %c0_127 = arith.constant 0 : index
    %197 = vector.load %arg13[%c1_125, %c0_126, %c0_127] : memref<2x1x32xf32, #tpu.memory_space<vmem>>, vector<1x1x32xf32>
    %198 = vector.shape_cast %197 : vector<1x1x32xf32> to vector<1x32xf32>
    %199 = vector.broadcast %198 : vector<1x32xf32> to vector<8x32xf32>
    %200 = arith.addf %196, %199 : vector<8x32xf32>
    %c2 = arith.constant 2 : index
    %c0_128 = arith.constant 0 : index
    %c0_129 = arith.constant 0 : index
    %201 = vector.load %arg5[%c2, %c0_128, %c0_129] : memref<3x32x64xf32, #tpu.memory_space<vmem>>, vector<1x32x64xf32>
    %202 = vector.shape_cast %201 : vector<1x32x64xf32> to vector<32x64xf32>
    %c2_130 = arith.constant 2 : index
    %c0_131 = arith.constant 0 : index
    %c0_132 = arith.constant 0 : index
    %203 = vector.load %arg6[%c2_130, %c0_131, %c0_132] : memref<3x64x2xf32, #tpu.memory_space<vmem>>, vector<1x64x2xf32>
    %204 = vector.shape_cast %203 : vector<1x64x2xf32> to vector<64x2xf32>
    %c2_133 = arith.constant 2 : index
    %c0_134 = arith.constant 0 : index
    %c0_135 = arith.constant 0 : index
    %205 = vector.load %arg7[%c2_133, %c0_134, %c0_135] : memref<3x64x2xf32, #tpu.memory_space<vmem>>, vector<1x64x2xf32>
    %206 = vector.shape_cast %205 : vector<1x64x2xf32> to vector<64x2xf32>
    %c2_136 = arith.constant 2 : index
    %c0_137 = arith.constant 0 : index
    %c0_138 = arith.constant 0 : index
    %207 = vector.load %arg8[%c2_136, %c0_137, %c0_138] : memref<3x4x2xf32, #tpu.memory_space<vmem>>, vector<1x4x2xf32>
    %208 = vector.shape_cast %207 : vector<1x4x2xf32> to vector<4x2xf32>
    %c2_139 = arith.constant 2 : index
    %c0_140 = arith.constant 0 : index
    %c0_141 = arith.constant 0 : index
    %209 = vector.load %arg9[%c2_139, %c0_140, %c0_141] : memref<3x32x32xf32, #tpu.memory_space<vmem>>, vector<1x32x32xf32>
    %210 = vector.shape_cast %209 : vector<1x32x32xf32> to vector<32x32xf32>
    %c2_142 = arith.constant 2 : index
    %c0_143 = arith.constant 0 : index
    %c0_144 = arith.constant 0 : index
    %211 = vector.load %arg10[%c2_142, %c0_143, %c0_144] : memref<3x4x32xf32, #tpu.memory_space<vmem>>, vector<1x4x32xf32>
    %212 = vector.shape_cast %211 : vector<1x4x32xf32> to vector<4x32xf32>
    %c2_145 = arith.constant 2 : index
    %c0_146 = arith.constant 0 : index
    %c0_147 = arith.constant 0 : index
    %213 = vector.load %arg11[%c2_145, %c0_146, %c0_147] : memref<3x1x32xf32, #tpu.memory_space<vmem>>, vector<1x1x32xf32>
    %214 = vector.shape_cast %213 : vector<1x1x32xf32> to vector<1x32xf32>
    %cst_148 = arith.constant dense<0.000000e+00> : vector<8x64xf32>
    %215 = tpu.matmul %200, %202, %cst_148 {dimension_numbers = #tpu.dot_dimension_numbers<[1], [0], [0], [1], [0, 0, 1, 1], [], []>} : vector<8x32xf32>, vector<32x64xf32>, vector<8x64xf32> -> vector<8x64xf32>
    %cst_149 = arith.constant dense<0.000000e+00> : vector<8x2xf32>
    %216 = tpu.matmul %215, %204, %cst_149 {dimension_numbers = #tpu.dot_dimension_numbers<[1], [0], [0], [1], [0, 0, 1, 1], [], []>} : vector<8x64xf32>, vector<64x2xf32>, vector<8x2xf32> -> vector<8x2xf32>
    %cst_150 = arith.constant dense<0.000000e+00> : vector<8x2xf32>
    %217 = tpu.matmul %215, %206, %cst_150 {dimension_numbers = #tpu.dot_dimension_numbers<[1], [0], [0], [1], [0, 0, 1, 1], [], []>} : vector<8x64xf32>, vector<64x2xf32>, vector<8x2xf32> -> vector<8x2xf32>
    %cst_151 = arith.constant dense<0.000000e+00> : vector<32x64xf32>
    %218 = tpu.matmul %0, %215, %cst_151 {dimension_numbers = #tpu.dot_dimension_numbers<[1], [0], [0], [1], [0, 0, 1, 1], [], []>} : vector<32x8xf32>, vector<8x64xf32>, vector<32x64xf32> -> vector<32x64xf32>
    %cst_152 = arith.constant dense<0.000000e+00> : vector<32x2xf32>
    %219 = tpu.matmul %1, %216, %cst_152 {dimension_numbers = #tpu.dot_dimension_numbers<[1], [0], [0], [1], [0, 0, 1, 1], [], []>} : vector<32x8xf32>, vector<8x2xf32>, vector<32x2xf32> -> vector<32x2xf32>
    %cst_153 = arith.constant dense<0.000000e+00> : vector<32x2xf32>
    %220 = tpu.matmul %0, %217, %cst_153 {dimension_numbers = #tpu.dot_dimension_numbers<[1], [0], [0], [1], [0, 0, 1, 1], [], []>} : vector<32x8xf32>, vector<8x2xf32>, vector<32x2xf32> -> vector<32x2xf32>
    %221 = arith.addf %219, %220 : vector<32x2xf32>
    %cst_154 = arith.constant dense<0.000000e+00> : vector<32x2xf32>
    %222 = tpu.matmul %3, %208, %cst_154 {dimension_numbers = #tpu.dot_dimension_numbers<[1], [0], [0], [1], [0, 0, 1, 1], [], []>} : vector<32x4xf32>, vector<4x2xf32>, vector<32x2xf32> -> vector<32x2xf32>
    %223 = arith.addf %221, %222 : vector<32x2xf32>
    %cst_155 = arith.constant 0.000000e+00 : f32
    %224 = vector.broadcast %cst_155 : f32 to vector<32x2xf32>
    %225 = arith.cmpf ogt, %223, %224 : vector<32x2xf32>
    %cst_156 = arith.constant 2.000000e-01 : f32
    %226 = vector.broadcast %cst_156 : f32 to vector<32x2xf32>
    %227 = arith.mulf %226, %223 : vector<32x2xf32>
    %228 = arith.select %225, %223, %227 : vector<32x2xi1>, vector<32x2xf32>
    %229 = vector.extract_strided_slice %228 {offsets = [0, 0], sizes = [32, 1], strides = [1, 1]} : vector<32x2xf32> to vector<32x1xf32>
    %cst_157 = arith.constant -1.000000e+30 : f32
    %230 = vector.shape_cast %229 : vector<32x1xf32> to vector<32x1xf32>
    %231 = vector.broadcast %230 : vector<32x1xf32> to vector<32x8xf32>
    %232 = vector.broadcast %cst_157 : f32 to vector<32x8xf32>
    %233 = arith.select %7, %231, %232 : vector<32x8xi1>, vector<32x8xf32>
    %cst_158 = arith.constant dense<0xFF800000> : vector<8xf32>
    %234 = vector.multi_reduction <maximumf>, %233, %cst_158 [0] : vector<32x8xf32> to vector<8xf32>
    %235 = vector.shape_cast %234 : vector<8xf32> to vector<1x8xf32>
    %236 = vector.extract_strided_slice %228 {offsets = [0, 1], sizes = [32, 1], strides = [1, 1]} : vector<32x2xf32> to vector<32x1xf32>
    %cst_159 = arith.constant -1.000000e+30 : f32
    %237 = vector.shape_cast %236 : vector<32x1xf32> to vector<32x1xf32>
    %238 = vector.broadcast %237 : vector<32x1xf32> to vector<32x8xf32>
    %239 = vector.broadcast %cst_159 : f32 to vector<32x8xf32>
    %240 = arith.select %7, %238, %239 : vector<32x8xi1>, vector<32x8xf32>
    %cst_160 = arith.constant dense<0xFF800000> : vector<8xf32>
    %241 = vector.multi_reduction <maximumf>, %240, %cst_160 [0] : vector<32x8xf32> to vector<8xf32>
    %242 = vector.shape_cast %241 : vector<8xf32> to vector<1x8xf32>
    %243 = tpu.concatenate %235, %242 in 0 : vector<1x8xf32>, vector<1x8xf32> -> vector<2x8xf32>
    %cst_161 = arith.constant dense<0.000000e+00> : vector<32x2xf32>
    %244 = tpu.matmul %1, %243, %cst_161 {dimension_numbers = #tpu.dot_dimension_numbers<[1], [1], [0], [0], [0, 0, 1, 0], [], []>} : vector<32x8xf32>, vector<2x8xf32>, vector<32x2xf32> -> vector<32x2xf32>
    %245 = arith.subf %228, %244 : vector<32x2xf32>
    %246 = math.exp %245 : vector<32x2xf32>
    %cst_162 = arith.constant dense<0.000000e+00> : vector<8x2xf32>
    %247 = tpu.matmul %2, %246, %cst_162 {dimension_numbers = #tpu.dot_dimension_numbers<[1], [0], [0], [1], [0, 0, 1, 1], [], []>} : vector<8x32xf32>, vector<32x2xf32>, vector<8x2xf32> -> vector<8x2xf32>
    %cst_163 = arith.constant dense<0.000000e+00> : vector<32x2xf32>
    %248 = tpu.matmul %1, %247, %cst_163 {dimension_numbers = #tpu.dot_dimension_numbers<[1], [0], [0], [1], [0, 0, 1, 1], [], []>} : vector<32x8xf32>, vector<8x2xf32>, vector<32x2xf32> -> vector<32x2xf32>
    %cst_164 = arith.constant 1.000000e-16 : f32
    %249 = vector.broadcast %cst_164 : f32 to vector<32x2xf32>
    %250 = arith.addf %248, %249 : vector<32x2xf32>
    %251 = tpu.reciprocal %250 {approx = true} : vector<32x2xf32> -> vector<32x2xf32>
    %252 = arith.mulf %246, %251 : vector<32x2xf32>
    %cst_165 = arith.constant dense<0.000000e+00> : vector<32x64xf32>
    %253 = tpu.matmul %252, %4, %cst_165 {dimension_numbers = #tpu.dot_dimension_numbers<[1], [0], [0], [1], [0, 0, 1, 1], [], []>} : vector<32x2xf32>, vector<2x64xf32>, vector<32x64xf32> -> vector<32x64xf32>
    %254 = arith.mulf %218, %253 : vector<32x64xf32>
    %cst_166 = arith.constant dense<0.000000e+00> : vector<8x64xf32>
    %255 = tpu.matmul %2, %254, %cst_166 {dimension_numbers = #tpu.dot_dimension_numbers<[1], [0], [0], [1], [0, 0, 1, 1], [], []>} : vector<8x32xf32>, vector<32x64xf32>, vector<8x64xf32> -> vector<8x64xf32>
    %cst_167 = arith.constant dense<0.000000e+00> : vector<8x32xf32>
    %256 = tpu.matmul %255, %5, %cst_167 {dimension_numbers = #tpu.dot_dimension_numbers<[1], [0], [0], [1], [0, 0, 1, 1], [], []>} : vector<8x64xf32>, vector<64x32xf32>, vector<8x32xf32> -> vector<8x32xf32>
    %cst_168 = arith.constant dense<0.000000e+00> : vector<32xf32>
    %257 = vector.multi_reduction <add>, %252, %cst_168 [1] : vector<32x2xf32> to vector<32xf32>
    %258 = vector.shape_cast %257 : vector<32xf32> to vector<32x1xf32>
    %cst_169 = arith.constant 5.000000e-01 : f32
    %259 = vector.broadcast %cst_169 : f32 to vector<32x1xf32>
    %260 = arith.mulf %258, %259 : vector<32x1xf32>
    %261 = vector.broadcast %260 : vector<32x1xf32> to vector<32x4xf32>
    %262 = arith.mulf %3, %261 : vector<32x4xf32>
    %cst_170 = arith.constant dense<0.000000e+00> : vector<8x4xf32>
    %263 = tpu.matmul %2, %262, %cst_170 {dimension_numbers = #tpu.dot_dimension_numbers<[1], [0], [0], [1], [0, 0, 1, 1], [], []>} : vector<8x32xf32>, vector<32x4xf32>, vector<8x4xf32> -> vector<8x4xf32>
    %cst_171 = arith.constant dense<0.000000e+00> : vector<8x32xf32>
    %264 = tpu.matmul %256, %210, %cst_171 {dimension_numbers = #tpu.dot_dimension_numbers<[1], [0], [0], [1], [0, 0, 1, 1], [], []>} : vector<8x32xf32>, vector<32x32xf32>, vector<8x32xf32> -> vector<8x32xf32>
    %cst_172 = arith.constant dense<0.000000e+00> : vector<8x32xf32>
    %265 = tpu.matmul %263, %212, %cst_172 {dimension_numbers = #tpu.dot_dimension_numbers<[1], [0], [0], [1], [0, 0, 1, 1], [], []>} : vector<8x4xf32>, vector<4x32xf32>, vector<8x32xf32> -> vector<8x32xf32>
    %266 = arith.addf %264, %265 : vector<8x32xf32>
    %267 = vector.broadcast %214 : vector<1x32xf32> to vector<8x32xf32>
    %268 = arith.addf %266, %267 : vector<8x32xf32>
    %cst_173 = arith.constant 0.000000e+00 : f32
    %269 = vector.broadcast %cst_173 : f32 to vector<8x32xf32>
    %270 = arith.maximumf %268, %269 : vector<8x32xf32>
    %271 = tpu.concatenate %270, %268 in 1 : vector<8x32xf32>, vector<8x32xf32> -> vector<8x64xf32>
    %c0_174 = arith.constant 0 : index
    %c0_175 = arith.constant 0 : index
    %272 = vector.load %arg16[%c0_174, %c0_175] : memref<8x64xf32, #tpu.memory_space<vmem>>, vector<8x64xf32>
    tpu.vector_store %arg16[%c0_174, %c0_175], %271 {strides = array<i32>} : memref<8x64xf32, #tpu.memory_space<vmem>>, vector<8x64xf32>,
    return
  }
}

</mosaic_0001>

<bundles_post_ra>
// kernel: tpu_custom_call.1
= control target key start
LH: loop header
LB: loop body
LE: loop exit
PB: predicated region body
PF: predicated region fallthrough
CT: control target
= control target key end

     0   :  { %s3283_s0 = inlined_call_operand.vmem [shape: f32[8,32], index: 0, kind: input, shape index: {}]   ;;  %s3284_s1 = inlined_call_operand.vmem [shape: f32[32,8], index: 1, kind: input, shape index: {}]   ;;  %s3285_s2 = inlined_call_operand.vmem [shape: f32[32,8], index: 2, kind: input, shape index: {}]   ;;  %s3286_s3 = inlined_call_operand.vmem [shape: f32[8,32], index: 3, kind: input, shape index: {}]   ;;  %s3287_s4 = inlined_call_operand.vmem [shape: f32[32,4], index: 4, kind: input, shape index: {}]   ;;  %s3288_s5 = inlined_call_operand.vmem [shape: f32[3,32,64], index: 5, kind: input, shape index: {}]   ;;  %s3289_s6 = inlined_call_operand.vmem [shape: f32[3,64,2], index: 6, kind: input, shape index: {}]   ;;  %s3290_s7 = inlined_call_operand.vmem [shape: f32[3,64,2], index: 7, kind: input, shape index: {}]   ;;  %s3291_s8 = inlined_call_operand.vmem [shape: f32[3,4,2], index: 8, kind: input, shape index: {}]   ;;  %s3292_s9 = inlined_call_operand.vmem [shape: f32[3,32,32], index: 9, kind: input, shape index: {}]   ;;  %s3293_s10 = inlined_call_operand.vmem [shape: f32[3,4,32], index: 10, kind: input, shape index: {}]   ;;  %s3294_s11 = inlined_call_operand.vmem [shape: f32[3,1,32], index: 11, kind: input, shape index: {}]   ;;  %s3295_s12 = inlined_call_operand.vmem [shape: f32[2,1,32], index: 12, kind: input, shape index: {}]   ;;  %s3296_s13 = inlined_call_operand.vmem [shape: f32[2,1,32], index: 13, kind: input, shape index: {}]   ;;  %s3297_s14 = inlined_call_operand.vmem [shape: f32[2,64], index: 14, kind: input, shape index: {}]   ;;  %s3298_s15 = inlined_call_operand.vmem [shape: f32[64,32], index: 15, kind: input, shape index: {}]   ;;  %s3299_s16 = inlined_call_operand.hbm [shape: f32[8,64], index: 16, kind: output, shape index: {}]  }
   0x1   :  { %3300 = sst [smem:[#allocation5_spill]] %s3283_s0 }
   0x2   :  { %v84_v0 = vld [vmem:[%s3288_s5 + $0x18] sm:$0xff]  ;;  %v83_v1 = vld [vmem:[%s3288_s5 + $0x10] sm:$0xff]  ;;  %v82_v2 = vld [vmem:[%s3288_s5 + $0x8] sm:$0xff]  ;;  %s3301_s26 = sld [smem:[#allocation5_spill]]  ;;  %vm108_vm0 = vcmask 261120  }
   0x3   :  { %124 = vmatpush.msra.mxu0 %v84_v0  ;;  %v92_v3 = vld [vmem:[%s3289_s6 + $0x38] sm:$0xff]  ;;  %v91_v5 = vld [vmem:[%s3289_s6 + $0x30] sm:$0xff]  ;;  %v90_v7 = vld [vmem:[%s3289_s6 + $0x28] sm:$0xff] }
   0x4   :  { %144 = vmatpush.msra.mxu1 %v92_v3  ;;  %v100_v4 = vld [vmem:[%s3290_s7 + $0x38] sm:$0xff]  ;;  %v99_v6 = vld [vmem:[%s3290_s7 + $0x30] sm:$0xff]  ;;  %v81_v8 = vld [vmem:[%s3288_s5] sm:$0xff] }
   0x5   :  { %125 = vmatpush.msra.mxu0 %v83_v1  ;;  %164 = vmatpush.msra.mxu2 %v100_v4  ;;  %v98_v10 = vld [vmem:[%s3290_s7 + $0x28] sm:$0xff]  ;;  %v89_v11 = vld [vmem:[%s3289_s6 + $0x20] sm:$0xff]  ;;  %v88_v13 = vld [vmem:[%s3289_s6 + $0x18] sm:$0xff] }
   0x6   :  { %145 = vmatpush.msra.mxu1 %v91_v5  ;;  %v97_v12 = vld [vmem:[%s3290_s7 + $0x20] sm:$0xff]  ;;  %v96_v14 = vld [vmem:[%s3290_s7 + $0x18] sm:$0xff] }
   0x7   :  { %126 = vmatpush.msra.mxu0 %v82_v2  ;;  %165 = vmatpush.msra.mxu2 %v99_v6 }
   0x8   :  { %v80_v9 = vld [vmem:[%s3301_s26] sm:$0xff]  ;;  %146 = vmatpush.msra.mxu1 %v90_v7 }
   0x9   :  { %127 = vmatpush.msra.mxu0 %v81_v8  ;;  %166 = vmatpush.msra.mxu2 %v98_v10 }
   0xa   :  { %1986 = vmatmul.msk.f32.vlgmr.msra.gmra.mxu0 %vm108_vm0, %v80_v9  ;;  %147 = vmatpush.msra.mxu1 %v89_v11 }
   0xb   :  { %21 = vsyncpa [#allocation3], 0  ;;  %167 = vmatpush.msra.mxu2 %v97_v12  ;;  %v87_v15 = vld [vmem:[%s3289_s6 + $0x10] sm:$0xff]  ;;  %v86_v17 = vld [vmem:[%s3289_s6 + $0x8] sm:$0xff]  ;;  %vm132_vm1 = vcmask 523264   ;;  %vm301_vm2 = vcmask 1043456  }
   0xc   :  { %148 = vmatpush.msra.mxu1 %v88_v13  ;;  %v95_v16 = vld [vmem:[%s3290_s7 + $0x10] sm:$0xff]  ;;  %v94_v18 = vld [vmem:[%s3290_s7 + $0x8] sm:$0xff]  ;;  %v85_v19 = vld [vmem:[%s3289_s6] sm:$0xff]  ;;  %vm288_vm3 = vcmask 31744   ;;  %vm176_vm4 = vcmask 64512   ;;  %v2296_v37 = vmov 1  }
   0xd   :  { %168 = vmatpush.msra.mxu2 %v96_v14  ;;  %v93_v20 = vld [vmem:[%s3290_s7] sm:$0xff]  ;;  %v2471_v25 = vld [vmem:[%s3287_s4 + $0x8] sm:$0xff]  ;;  %v2485_v27 = vld [vmem:[%s3287_s4 + $0x10] sm:$0xff]  ;;  %2171 = vset.pattern.permute.xlu2 %v2296_v37  ;;  %v2297_v38 = vmov 0   ;;  %vm420_vm13 = vcmask 1040384   ;;  %vm539_vm14 = vcmask 1041408  }
   0xe   :  { %149 = vmatpush.msra.mxu1 %v87_v15  ;;  %v101_v22 = vld [vmem:[%s3291_s8] sm:$0xf]  ;;  %v2480_v26 = vld [vmem:[%s3284_s1 + $0x8] sm:$0xff]  ;;  %v2494_v28 = vld [vmem:[%s3284_s1 + $0x10] sm:$0xff]  ;;  %2170 = vset.pattern.permute.xlu0 %v2297_v38  ;;  %vm526_vm15 = vcmask 15360  }
   0xf   :  { %169 = vmatpush.msra.mxu2 %v95_v16  ;;  %v2458_v23 = vld [vmem:[%s3287_s4] sm:$0xff]  ;;  %v2499_v29 = vld [vmem:[%s3287_s4 + $0x18] sm:$0xff]  ;;  %v2522_v34 = vld [vmem:[%s3285_s2 + $0x8] sm:$0xff]  ;;  %2172 = vset.pattern.permute.xlu1 %v2297_v38 }
  0x10   :  { %150 = vmatpush.msra.mxu1 %v86_v17  ;;  %v2466_v24 = vld [vmem:[%s3284_s1] sm:$0xff]  ;;  %v2513_v31 = vld [vmem:[%s3284_s1 + $0x18] sm:$0xff]  ;;  %v2531_v35 = vld [vmem:[%s3285_s2 + $0x10] sm:$0xff]  ;;  %vm77_vm9 = vcmp.gt.f32.partialorder %v2522_v34, 0.5 }
  0x11   :  { %170 = vmatpush.msra.mxu2 %v94_v18  ;;  %v2508_v30 = vld [vmem:[%s3285_s2] sm:$0xff]  ;;  %v2540_v36 = vld [vmem:[%s3285_s2 + $0x18] sm:$0xff]  ;;  %vm78_vm10 = vcmp.gt.f32.partialorder %v2531_v35, 0.5 }
  0x12   :  { %151 = vmatpush.msra.mxu1 %v85_v19  ;;  %vm76_vm11 = vcmp.gt.f32.partialorder %v2508_v30, 0.5  ;;  %vm79_vm12 = vcmp.gt.f32.partialorder %v2540_v36, 0.5 }
  0x13   :  { %171 = vmatpush.msra.mxu2 %v93_v20 }
  0x15   :  { %2001 = vmatpush.msk.msrb.mxu2 %vm301_vm2, %v101_v22 }
  0x87   :  { %v129_v21 = vpop.f32.mrf.mxu0 }
  0x88   :  { %1987 = vmatmul.msk.f32.vlgmr.msra.gmra.mxu1 %vm132_vm1, %v129_v21  ;;  %1988 = vmatmul.msk.f32.vlgmr.msra.gmra.mxu2 %vm132_vm1, %v129_v21 }
  0x89   :  { %204 = vmatpush.msra.mxu3 %v129_v21 }
  0x8a   :  { %1989 = vmatmul.msk.f32.vlgmr.msra.gmra.mxu3 %vm176_vm4, %v2466_v24 }
  0x90   :  { %2002 = vmatmul.msk.f32.vlgmr.msrb.gmra.mxu2 %vm288_vm3, %v2458_v23 }
  0x92   :  { %1990 = vmatmul.msk.f32.gmra.mxu3 %vm176_vm4, %v2480_v26 }
  0x98   :  { %2003 = vmatmul.msk.f32.gmra.mxu2 %vm288_vm3, %v2471_v25 }
  0x9a   :  { %1991 = vmatmul.msk.f32.gmra.mxu3 %vm176_vm4, %v2494_v28 }
  0xa0   :  { %2004 = vmatmul.msk.f32.gmra.mxu2 %vm288_vm3, %v2485_v27 }
  0xa2   :  { %1992 = vmatmul.msk.f32.gmra.mxu3 %vm176_vm4, %v2513_v31 }
  0xa8   :  { %2005 = vmatmul.msk.f32.gmra.mxu2 %vm288_vm3, %v2499_v29 }
 0x105   :  { %v153_v32 = vpop.f32.mrf.mxu1 }
 0x106   :  { %274 = vmatpush.msrb.mxu1 %v153_v32 }
 0x107   :  { %1997 = vmatmul.msk.f32.vlgmr.msrb.gmra.mxu1 %vm176_vm4, %v2508_v30 }
 0x10b   :  { %v173_v33 = vpop.f32.mrf.mxu2 }
 0x10c   :  { %233 = vmatpush.msrb.mxu0 %v173_v33 }
 0x10d   :  { %1993 = vmatmul.msk.f32.vlgmr.msrb.gmra.mxu0 %vm176_vm4, %v2466_v24 }
 0x10f   :  { %1998 = vmatmul.msk.f32.gmra.mxu1 %vm176_vm4, %v2522_v34 }
 0x113   :  { %v322_v40 = vpop.f32.mrf.mxu2 }
 0x115   :  { %1994 = vmatmul.msk.f32.gmra.mxu0 %vm176_vm4, %v2480_v26 }
 0x117   :  { %1999 = vmatmul.msk.f32.gmra.mxu1 %vm176_vm4, %v2531_v35 }
 0x11b   :  { %v325_v45 = vpop.f32.mrf.mxu2 }
 0x11d   :  { %1995 = vmatmul.msk.f32.gmra.mxu0 %vm176_vm4, %v2494_v28 }
 0x11f   :  { %2000 = vmatmul.msk.f32.gmra.mxu1 %vm176_vm4, %v2540_v36 }
 0x123   :  { %v328_v53 = vpop.f32.mrf.mxu2 }
 0x125   :  { %1996 = vmatmul.msk.f32.gmra.mxu0 %vm176_vm4, %v2513_v31 }
 0x12b   :  { %v331_v62 = vpop.f32.mrf.mxu2 }
 0x184   :  { %v276_v39 = vpop.f32.mrf.mxu1 }
 0x18a   :  { %v235_v41 = vpop.f32.mrf.mxu0 }
 0x18b   :  { %v277_v42 = vadd.f32 %v276_v39, %v235_v41 }
 0x18c   :  { %v279_v43 = vpop.f32.mrf.mxu1 }
 0x18d   :  { %v334_v44 = vadd.f32 %v322_v40, %v277_v42 }
 0x18f   :  { %v342_v46 = vmul.f32 0.2, %v334_v44  ;;  %vm338_vm5 = vcmp.gt.f32.partialorder %v334_v44, 0.0 }
 0x191   :  { %v2551_v47 = vsel %vm338_vm5, %v334_v44, %v342_v46 }
 0x192   :  { %388 = vperm.xlu2 %2171, %v2551_v47   ;;  %352 = vperm.xlu0 %2170, %v2551_v47   ;;  %v238_v48 = vpop.f32.mrf.mxu0 }
 0x193   :  { %v280_v49 = vadd.f32 %v279_v43, %v238_v48 }
 0x194   :  { %v282_v51 = vpop.f32.mrf.mxu1 }
 0x195   :  { %v335_v50 = vadd.f32 %v325_v45, %v280_v49 }
 0x197   :  { %v343_v52 = vmul.f32 0.2, %v335_v50  ;;  %vm339_vm6 = vcmp.gt.f32.partialorder %v335_v50, 0.0 }
 0x199   :  { %v2555_v54 = vsel %vm339_vm6, %v335_v50, %v343_v52 }
 0x19a   :  { %392 = vperm.xlu2 %2171, %v2555_v54   ;;  %357 = vperm.xlu0 %2170, %v2555_v54   ;;  %v241_v55 = vpop.f32.mrf.mxu0 }
 0x19b   :  { %v283_v56 = vadd.f32 %v282_v51, %v241_v55 }
 0x19c   :  { %v285_v59 = vpop.f32.mrf.mxu1 }
 0x19d   :  { %v336_v57 = vadd.f32 %v328_v53, %v283_v56 }
 0x19f   :  { %v344_v58 = vmul.f32 0.2, %v336_v57  ;;  %vm340_vm7 = vcmp.gt.f32.partialorder %v336_v57, 0.0 }
 0x1a1   :  { %v2559_v60 = vsel %vm340_vm7, %v336_v57, %v344_v58 }
 0x1a2   :  { %2173 = vset.pattern.permute.xlu0 %v2296_v37  ;;  %362 = vperm.xlu1 %2172, %v2559_v60   ;;  %v244_v61 = vpop.f32.mrf.mxu0 }
 0x1a3   :  { %v286_v63 = vadd.f32 %v285_v59, %v244_v61  ;;  %396 = vperm.xlu0 %2173, %v2559_v60   ;;  %2175 = vset.pattern.permute.xlu2 %v2297_v38 }
 0x1a5   :  { %v337_v0 = vadd.f32 %v331_v62, %v286_v63  ;;  %v2609_v63 = vpop.f32.mrf.mxu3 }
 0x1a7   :  { %v345_v1 = vmul.f32 0.2, %v337_v0  ;;  %vm341_vm8 = vcmp.gt.f32.partialorder %v337_v0, 0.0 }
 0x1a9   :  { %v2565_v2 = vsel %vm341_vm8, %v337_v0, %v345_v1 }
 0x1aa   :  { %367 = vperm.xlu1 %2172, %v2565_v2  }
 0x1ab   :  { %2176 = vset.pattern.permute.xlu0 %v2297_v38 }
 0x1ad   :  { %v2611_v0 = vpop.f32.mrf.mxu3 }
 0x1b2   :  { %2174 = vset.pattern.permute.xlu1 %v2296_v37 }
 0x1b3   :  { %400 = vperm.xlu1 %2174, %v2565_v2  }
 0x1b5   :  { %v2613_v1 = vpop.f32.mrf.mxu3 }
 0x1ec   :  { %v389_v5 = vpop.permute.xlu2 %388 }
 0x1ed   :  { %v403_v32 = vsel %vm76_vm11, %v389_v5, -1e+30 }
 0x1ee   :  { %v407_v43 = vsel %vm176_vm4, %v403_v32, -inf }
 0x1f4   :  { %v393_v16 = vpop.permute.xlu2 %392 }
 0x1f5   :  { %v404_v21 = vsel %vm77_vm9, %v393_v16, -1e+30 }
 0x1f6   :  { %v408_v39 = vsel %vm176_vm4, %v404_v21, -inf }
 0x1f7   :  { %v411_v46 = vmax.f32 %v407_v43, %v408_v39 }
 0x204   :  { %v353_v3 = vpop.permute.xlu0 %352 }
 0x205   :  { %v370_v8 = vsel %vm76_vm11, %v353_v3, -1e+30  ;;  %v2615_v3 = vpop.f32.mrf.mxu3 }
 0x206   :  { %v374_v13 = vsel %vm176_vm4, %v370_v8, -inf }
 0x20c   :  { %v358_v6 = vpop.permute.xlu0 %357 }
 0x20d   :  { %v371_v7 = vsel %vm77_vm9, %v358_v6, -1e+30 }
 0x20e   :  { %v375_v10 = vsel %vm176_vm4, %v371_v7, -inf }
 0x20f   :  { %v378_v17 = vmax.f32 %v374_v13, %v375_v10 }
 0x214   :  { %v363_v4 = vpop.permute.xlu1 %362 }
 0x215   :  { %v372_v9 = vsel %vm78_vm10, %v363_v4, -1e+30  ;;  %v397_v19 = vpop.permute.xlu0 %396 }
 0x216   :  { %v376_v14 = vsel %vm176_vm4, %v372_v9, -inf  ;;  %v405_v33 = vsel %vm78_vm10, %v397_v19, -1e+30 }
 0x217   :  { %v409_v44 = vsel %vm176_vm4, %v405_v33, -inf }
 0x21c   :  { %v368_v11 = vpop.permute.xlu1 %367 }
 0x21d   :  { %v373_v12 = vsel %vm79_vm12, %v368_v11, -1e+30 }
 0x21e   :  { %v377_v15 = vsel %vm176_vm4, %v373_v12, -inf }
 0x21f   :  { %v379_v18 = vmax.f32 %v376_v14, %v377_v15 }
 0x221   :  { %v380_v20 = vmax.f32 %v378_v17, %v379_v18  ;;  %v2639_v18 = vld [vmem:[%s3297_s14] sm:$0x3] }
 0x222   :  { %2016 = vmatpush.msk.msra.mxu1 %vm539_vm14, %v2639_v18 }
 0x223   :  { %v381_v22 = vrot.slane %v380_v20, 4 }
 0x225   :  { %v401_v40 = vpop.permute.xlu1 %400  ;;  %v382_v41 = vmax.f32 %v380_v20, %v381_v22 }
 0x226   :  { %v406_v42 = vsel %vm79_vm12, %v401_v40, -1e+30 }
 0x227   :  { %v410_v45 = vsel %vm176_vm4, %v406_v42, -inf  ;;  %v383_v49 = vrot.slane %v382_v41, 2 }
 0x228   :  { %v412_v48 = vmax.f32 %v409_v44, %v410_v45 }
 0x229   :  { %v384_v53 = vmax.f32 %v382_v41, %v383_v49 }
 0x22a   :  { %v413_v50 = vmax.f32 %v411_v46, %v412_v48 }
 0x22b   :  { %v385_v56 = vrot.slane %v384_v53, 1 }
 0x22c   :  { %v414_v51 = vrot.slane %v413_v50, 4 }
 0x22d   :  { %v386_v59 = vmax.f32 %v384_v53, %v385_v56 }
 0x22e   :  { %v415_v52 = vmax.f32 %v413_v50, %v414_v51 }
 0x230   :  { %v416_v55 = vrot.slane %v415_v52, 2 }
 0x232   :  { %v417_v57 = vmax.f32 %v415_v52, %v416_v55 }
 0x234   :  { %v418_v58 = vrot.slane %v417_v57, 1 }
 0x236   :  { %v419_v61 = vmax.f32 %v417_v57, %v418_v58  ;;  %v2654_v57 = vld [vmem:[%s3298_s15 + $0x38] sm:$0xff]  ;;  %v2659_v58 = vld [vmem:[%s3298_s15 + $0x30] sm:$0xff] }
 0x238   :  { %v421_v62 = vsel %vm420_vm13, %v386_v59, %v419_v61  ;;  %v2665_v59 = vld [vmem:[%s3298_s15 + $0x28] sm:$0xff]  ;;  %v2671_v61 = vld [vmem:[%s3298_s15 + $0x20] sm:$0xff] }
 0x239   :  { %2006 = vmatpush.xpose.msk.msrb.mxu3 %vm176_vm4, %v421_v62  ;;  %v2677_v62 = vld [vmem:[%s3298_s15 + $0x18] sm:$0xff] }
 0x23c   :  { %2007 = vmatmul.msk.f32.vlgmr.msrb.gmra.mxu3 %vm176_vm4, %v2508_v30 }
 0x23d   :  { %607 = vmatpush.msra.mxu3 %v2654_v57 }
 0x23f   :  { %608 = vmatpush.msra.mxu3 %v2659_v58 }
 0x241   :  { %609 = vmatpush.msra.mxu3 %v2665_v59 }
 0x243   :  { %610 = vmatpush.msra.mxu3 %v2671_v61 }
 0x244   :  { %2008 = vmatmul.msk.f32.gmra.mxu3 %vm176_vm4, %v2522_v34 }
 0x245   :  { %611 = vmatpush.msra.mxu3 %v2677_v62 }
 0x24c   :  { %2009 = vmatmul.msk.f32.gmra.mxu3 %vm176_vm4, %v2531_v35 }
 0x254   :  { %2010 = vmatmul.msk.f32.gmra.mxu3 %vm176_vm4, %v2540_v36 }
 0x2bf   :  { %v442_v4 = vpop.f32.mrf.mxu3 }
 0x2c0   :  { %v454_v11 = vsub.f32 %v2551_v47, %v442_v4 }
 0x2c2   :  { %v458_v15 = vmul.f32 1.442695, %v454_v11 }
 0x2c7   :  { %v445_v5 = vpop.f32.mrf.mxu3 }
 0x2c8   :  { %v455_v9 = vsub.f32 %v2555_v54, %v445_v5  ;;  %v2624_v54 = vld [vmem:[%s3286_s3] sm:$0xff]  ;;  %v2683_v5 = vld [vmem:[%s3298_s15 + $0x10] sm:$0xff] }
 0x2c9   :  { %612 = vmatpush.msra.mxu3 %v2683_v5 }
 0x2ca   :  { %v460_v14 = vmul.f32 1.442695, %v455_v9 }
 0x2cf   :  { %v448_v6 = vpop.f32.mrf.mxu3 }
 0x2d0   :  { %v456_v7 = vsub.f32 %v2559_v60, %v448_v6  ;;  %v2689_v6 = vld [vmem:[%s3298_s15 + $0x8] sm:$0xff] }
 0x2d1   :  { %613 = vmatpush.msra.mxu3 %v2689_v6 }
 0x2d2   :  { %v462_v12 = vmul.f32 1.442695, %v456_v7 }
 0x2d7   :  { %v451_v8 = vpop.f32.mrf.mxu3 }
 0x2d8   :  { %v457_v10 = vsub.f32 %v2565_v2, %v451_v8 }
 0x2da   :  { %v464_v13 = vmul.f32 1.442695, %v457_v10 }
 0x2dc   :  { %2194 = vpow2.f32 %v464_v13 }
 0x2dd   :  { %2196 = vpow2.f32 %v462_v12 }
 0x2de   :  { %2198 = vpow2.f32 %v460_v14 }
 0x2df   :  { %2200 = vpow2.f32 %v458_v15 }
 0x2e2   :  { %v2195_v16 = vpop.eup %2194 }
 0x2e3   :  { %481 = vmatpush.msra.mxu0 %v2195_v16  ;;  %v2197_v17 = vpop.eup %2196 }
 0x2e4   :  { %v2199_v60 = vpop.eup %2198 }
 0x2e5   :  { %482 = vmatpush.msra.mxu0 %v2197_v17  ;;  %v2201_v47 = vpop.eup %2200 }
 0x2e7   :  { %483 = vmatpush.msra.mxu0 %v2199_v60 }
 0x2e9   :  { %484 = vmatpush.msra.mxu0 %v2201_v47 }
 0x2ea   :  { %2011 = vmatmul.msk.f32.vlgmr.msra.gmra.mxu0 %vm108_vm0, %v2624_v54 }
 0x367   :  { %v486_v2 = vpop.f32.mrf.mxu0 }
 0x368   :  { %504 = vmatpush.msrb.mxu0 %v486_v2 }
 0x369   :  { %2012 = vmatmul.msk.f32.vlgmr.msrb.gmra.mxu0 %vm176_vm4, %v2508_v30 }
 0x371   :  { %2013 = vmatmul.msk.f32.gmra.mxu0 %vm176_vm4, %v2522_v34 }
 0x379   :  { %2014 = vmatmul.msk.f32.gmra.mxu0 %vm176_vm4, %v2531_v35 }
 0x381   :  { %2015 = vmatmul.msk.f32.gmra.mxu0 %vm176_vm4, %v2540_v36 }
 0x3e6   :  { %v506_v19 = vpop.f32.mrf.mxu0 }
 0x3e7   :  { %v507_v20 = vadd.f32 1e-16, %v506_v19  ;;  %v105_v19 = vld [vmem:[%s3292_s9 + $0x18] sm:$0xff] }
 0x3e9   :  { %2202 = vrcp.f32 %v507_v20  ;;  %v104_v20 = vld [vmem:[%s3292_s9 + $0x10] sm:$0xff] }
 0x3ee   :  { %v509_v21 = vpop.f32.mrf.mxu0 }
 0x3ef   :  { %v2203_v22 = vpop.eup %2202  ;;  %v510_v32 = vadd.f32 1e-16, %v509_v21  ;;  %v103_v21 = vld [vmem:[%s3292_s9 + $0x8] sm:$0xff] }
 0x3f0   :  { %v522_v33 = vmul.f32 %v2203_v22, %v2201_v47 }
 0x3f1   :  { %2204 = vrcp.f32 %v510_v32 }
 0x3f2   :  { %2017 = vmatmul.msk.f32.vlgmr.msra.gmra.mxu1 %vm526_vm15, %v522_v33  ;;  %v619_v53 = vsel %vm526_vm15, %v522_v33, 0.0  ;;  %v106_v33 = vld [vmem:[%s3293_s10] sm:$0xf] }
 0x3f6   :  { %v512_v39 = vpop.f32.mrf.mxu0 }
 0x3f7   :  { %v2205_v40 = vpop.eup %2204  ;;  %v513_v41 = vadd.f32 1e-16, %v512_v39  ;;  %v102_v39 = vld [vmem:[%s3292_s9] sm:$0xff] }
 0x3f8   :  { %v523_v42 = vmul.f32 %v2205_v40, %v2199_v60 }
 0x3f9   :  { %2206 = vrcp.f32 %v513_v41 }
 0x3fa   :  { %2018 = vmatmul.msk.f32.gmra.mxu1 %vm526_vm15, %v523_v42  ;;  %v622_v43 = vsel %vm526_vm15, %v523_v42, 0.0  ;;  %v2187_v42 = vld [vmem:[%s3294_s11] ss:$0 sm:$0xff] }
 0x3fb   :  { %623 = vadd.xlane.f32.xlu0 %v622_v43 }
 0x3fe   :  { %v515_v44 = vpop.f32.mrf.mxu0 }
 0x3ff   :  { %v2207_v45 = vpop.eup %2206  ;;  %v516_v46 = vadd.f32 1e-16, %v515_v44 }
 0x400   :  { %v524_v48 = vmul.f32 %v2207_v45, %v2197_v17 }
 0x401   :  { %2208 = vrcp.f32 %v516_v46 }
 0x402   :  { %2019 = vmatmul.msk.f32.gmra.mxu1 %vm526_vm15, %v524_v48  ;;  %v625_v49 = vsel %vm526_vm15, %v524_v48, 0.0 }
 0x403   :  { %626 = vadd.xlane.f32.xlu1 %v625_v49  ;;  %v2298_v49 = vmov 32.0  }
 0x404   :  { %2210 = vrcp.f32 %v2298_v49 }
 0x407   :  { %v2209_v50 = vpop.eup %2208 }
 0x408   :  { %v525_v51 = vmul.f32 %v2209_v50, %v2195_v16 }
 0x40a   :  { %2020 = vmatmul.msk.f32.gmra.mxu1 %vm526_vm15, %v525_v51  ;;  %v628_v52 = vsel %vm526_vm15, %v525_v51, 0.0  ;;  %v2211_v50 = vpop.eup %2210 }
 0x40b   :  { %629 = vadd.xlane.f32.xlu2 %v628_v52  ;;  %v717_v51 = vmul.f32 32.0, %v2211_v50  ;;  %vm721_vm5 = vweird.f32 %v2211_v50 }
 0x40d   :  { %v718_v52 = vsub.f32 1.0, %v717_v51  ;;  %v2189_v51 = vld [vmem:[%s3296_s13] ss:$0 sm:$0xff] }
 0x413   :  { %620 = vadd.xlane.f32.xlu2 %v619_v53  ;;  %v719_v53 = vmul.f32 %v2211_v50, %v718_v52 }
 0x46e   :  { %v624_v14 = vpop.xlane.xlu0 %623 }
 0x46f   :  { %v560_v55 = vpop.f32.mrf.mxu1  ;;  %v632_v60 = vmul.f32 0.5, %v624_v14  ;;  %v2027_v14 = vld [vmem:[%s3288_s5 + $0x20] sm:$0xff] }
 0x470   :  { %v572_v15 = vmul.f32 %v560_v55, %v2609_v63  ;;  %v2708_v63 = vld [vmem:[%s3298_s15] sm:$0xff]  ;;  %v720_v55 = vadd.f32 %v2211_v50, %v719_v53 }
 0x471   :  { %614 = vmatpush.msra.mxu3 %v2708_v63 }
 0x473   :  { %700 = vmatpush.msrb.mxu3 %v105_v19  ;;  %v2043_v19 = vld [vmem:[%s3290_s7 + $0x60] sm:$0xff] }
 0x475   :  { %701 = vmatpush.msrb.mxu3 %v104_v20 }
 0x476   :  { %v627_v11 = vpop.xlane.xlu1 %626 }
 0x477   :  { %v563_v56 = vpop.f32.mrf.mxu1  ;;  %v633_v16 = vmul.f32 0.5, %v627_v11  ;;  %702 = vmatpush.msrb.mxu3 %v103_v21  ;;  %v2030_v11 = vld [vmem:[%s3288_s5 + $0x38] sm:$0xff] }
 0x478   :  { %v573_v12 = vmul.f32 %v563_v56, %v2611_v0  ;;  %v636_v0 = vmul.f32 %v632_v60, %v2471_v25  ;;  %v2734_v56 = vsel %vm721_vm5, %v2211_v50, %v720_v55  ;;  %v2045_v60 = vld [vmem:[%s3290_s7 + $0x70] sm:$0xff]  ;;  %v2034_v21 = vld [vmem:[%s3289_s6 + $0x58] sm:$0xff]  ;;  %v2031_v55 = vld [vmem:[%s3289_s6 + $0x40] sm:$0xff] }
 0x479   :  { %703 = vmatpush.msrb.mxu3 %v102_v39  ;;  %v2032_v39 = vld [vmem:[%s3289_s6 + $0x48] sm:$0xff] }
 0x47e   :  { %v630_v7 = vpop.xlane.xlu2 %629 }
 0x47f   :  { %v566_v4 = vpop.f32.mrf.mxu1  ;;  %v634_v13 = vmul.f32 0.5, %v630_v7 }
 0x480   :  { %v574_v10 = vmul.f32 %v566_v4, %v2613_v1  ;;  %v637_v1 = vmul.f32 %v633_v16, %v2485_v27  ;;  %v2046_v16 = vld [vmem:[%s3290_s7 + $0x78] sm:$0xff] }
 0x481   :  { %v638_v47 = vmul.f32 %v634_v13, %v2499_v29  ;;  %v2028_v13 = vld [vmem:[%s3288_s5 + $0x28] sm:$0xff]  ;;  %840 = vmatpush.msrb.mxu1 %v2046_v16 }
 0x483   :  { %841 = vmatpush.msrb.mxu1 %v2045_v60 }
 0x486   :  { %v621_v17 = vpop.xlane.xlu2 %620 }
 0x487   :  { %v569_v8 = vpop.f32.mrf.mxu1 }
 0x488   :  { %v575_v9 = vmul.f32 %v569_v8, %v2615_v3  ;;  %v631_v3 = vmul.f32 0.5, %v621_v17  ;;  %v2037_v17 = vld [vmem:[%s3289_s6 + $0x70] sm:$0xff] }
 0x48a   :  { %588 = vmatpush.msra.mxu2 %v575_v9  ;;  %v635_v2 = vmul.f32 %v631_v3, %v2458_v23 }
 0x48c   :  { %589 = vmatpush.msra.mxu2 %v574_v10 }
 0x48e   :  { %590 = vmatpush.msra.mxu2 %v573_v12  ;;  %v2029_v12 = vld [vmem:[%s3288_s5 + $0x30] sm:$0xff] }
 0x490   :  { %591 = vmatpush.msra.mxu2 %v572_v15  ;;  %v2038_v15 = vld [vmem:[%s3289_s6 + $0x78] sm:$0xff] }
 0x491   :  { %2021 = vmatmul.msk.f32.vlgmr.msra.gmra.mxu2 %vm108_vm0, %v2624_v54  ;;  %820 = vmatpush.msra.mxu0 %v2038_v15 }
 0x492   :  { %651 = vmatpush.msrb.mxu2 %v638_v47  ;;  %v2036_v47 = vld [vmem:[%s3289_s6 + $0x68] sm:$0xff] }
 0x493   :  { %821 = vmatpush.msra.mxu0 %v2037_v17 }
 0x494   :  { %652 = vmatpush.msrb.mxu2 %v637_v1  ;;  %v2044_v1 = vld [vmem:[%s3290_s7 + $0x68] sm:$0xff] }
 0x495   :  { %822 = vmatpush.msra.mxu0 %v2036_v47  ;;  %842 = vmatpush.msrb.mxu1 %v2044_v1 }
 0x496   :  { %653 = vmatpush.msrb.mxu2 %v636_v0 }
 0x497   :  { %843 = vmatpush.msrb.mxu1 %v2043_v19 }
 0x498   :  { %654 = vmatpush.msrb.mxu2 %v635_v2  ;;  %v2035_v2 = vld [vmem:[%s3289_s6 + $0x60] sm:$0xff] }
 0x499   :  { %2023 = vmatmul.msk.f32.vlgmr.msrb.gmra.mxu2 %vm108_vm0, %v2624_v54  ;;  %823 = vmatpush.msra.mxu0 %v2035_v2 }
 0x49a   :  { %2024 = vmatpush.msk.msra.mxu2 %vm301_vm2, %v106_v33  ;;  %v2041_v33 = vld [vmem:[%s3290_s7 + $0x50] sm:$0xff] }
 0x49b   :  { %824 = vmatpush.msra.mxu0 %v2034_v21 }
 0x49c   :  { %801 = vmatpush.msrb.mxu2 %v2030_v11 }
 0x49e   :  { %802 = vmatpush.msrb.mxu2 %v2029_v12 }
 0x4a0   :  { %803 = vmatpush.msrb.mxu2 %v2028_v13 }
 0x4a2   :  { %804 = vmatpush.msrb.mxu2 %v2027_v14 }
 0x514   :  { %v593_v22 = vpop.f32.mrf.mxu2 }
 0x515   :  { %2022 = vmatmul.msk.f32.vlgmr.msra.gmra.mxu3 %vm132_vm1, %v593_v22  ;;  %v2042_v22 = vld [vmem:[%s3290_s7 + $0x58] sm:$0xff] }
 0x516   :  { %844 = vmatpush.msrb.mxu1 %v2042_v22 }
 0x518   :  { %845 = vmatpush.msrb.mxu1 %v2041_v33 }
 0x51c   :  { %v656_v32 = vpop.f32.mrf.mxu2 }
 0x51d   :  { %2025 = vmatmul.msk.f32.vlgmr.msra.gmra.mxu2 %vm288_vm3, %v656_v32  ;;  %v2033_v32 = vld [vmem:[%s3289_s6 + $0x50] sm:$0xff] }
 0x51e   :  { %825 = vmatpush.msra.mxu0 %v2033_v32 }
 0x520   :  { %826 = vmatpush.msra.mxu0 %v2032_v39 }
 0x522   :  { %827 = vmatpush.msra.mxu0 %v2031_v55 }
 0x598   :  { %v616_v40 = vpop.f32.mrf.mxu3 }
 0x599   :  { %2026 = vmatmul.msk.f32.vlgmr.msrb.gmra.mxu3 %vm108_vm0, %v616_v40  ;;  %v2040_v40 = vld [vmem:[%s3290_s7 + $0x48] sm:$0xff] }
 0x59a   :  { %846 = vmatpush.msrb.mxu1 %v2040_v40 }
 0x5a0   :  { %v682_v41 = vpop.f32.mrf.mxu2 }
 0x61c   :  { %v705_v43 = vpop.f32.mrf.mxu3 }
 0x61d   :  { %v706_v44 = vadd.f32 %v705_v43, %v682_v41 }
 0x61f   :  { %v711_v45 = vadd.f32 %v2187_v42, %v706_v44 }
 0x621   :  { %v712_v46 = vmax.f32 %v711_v45, 0.0 }
 0x623   :  { %v713_v48 = vsel %vm108_vm0, %v712_v46, 0.0 }
 0x624   :  { %714 = vadd.xlane.f32.xlu2 %v713_v48  ;;  %v2188_v48 = vld [vmem:[%s3295_s12] ss:$0 sm:$0xff] }
 0x697   :  { %v715_v4 = vpop.xlane.xlu2 %714 }
 0x698   :  { %v723_v7 = vmul.f32 %v2734_v56, %v715_v4  ;;  %v2039_v4 = vld [vmem:[%s3290_s7 + $0x40] sm:$0xff] }
 0x699   :  { %847 = vmatpush.msrb.mxu1 %v2039_v4 }
 0x69a   :  { %v724_v8 = vsub.f32 %v712_v46, %v723_v7 }
 0x69c   :  { %v725_v9 = vmul.f32 %v724_v8, %v724_v8 }
 0x69e   :  { %v726_v10 = vsel %vm108_vm0, %v725_v9, 0.0 }
 0x69f   :  { %727 = vadd.xlane.f32.xlu1 %v726_v10 }
 0x712   :  { %v728_v3 = vpop.xlane.xlu1 %727 }
 0x713   :  { %v729_v0 = vmul.f32 %v728_v3, %v2734_v56 }
 0x715   :  { %v730_v20 = vadd.f32 1e-05, %v729_v0 }
 0x717   :  { %2212 = vrsqrt.f32 %v730_v20  ;;  %vm737_vm7 = vweird.f32 %v730_v20 }
 0x71d   :  { %v2213_v41 = vpop.eup %2212 }
 0x71e   :  { %v732_v42 = vmul.f32 %v2213_v41, %v730_v20  ;;  %vm738_vm6 = vweird.f32 %v2213_v41 }
 0x71f   :  { %vm739_vm8 = vmor %vm737_vm7, %vm738_vm6 }
 0x720   :  { %v733_v43 = vmul.f32 %v2213_v41, %v732_v42 }
 0x722   :  { %v734_v44 = vmul.f32 0.5, %v733_v43 }
 0x724   :  { %v735_v45 = vsub.f32 1.5, %v734_v44 }
 0x726   :  { %v736_v46 = vmul.f32 %v2213_v41, %v735_v45 }
 0x728   :  { %v740_v49 = vsel %vm739_vm8, %v2213_v41, %v736_v46 }
 0x729   :  { %v741_v50 = vmul.f32 %v740_v49, %v724_v8  ;;  %v2047_v8 = vld [vmem:[%s3291_s8 + $0x4] sm:$0xf] }
 0x72a   :  { %2069 = vmatpush.msk.msra.mxu1 %vm301_vm2, %v2047_v8 }
 0x72b   :  { %v746_v52 = vmul.f32 %v2188_v48, %v741_v50 }
 0x72d   :  { %v751_v53 = vadd.f32 %v2189_v51, %v746_v52 }
 0x72f   :  { %2054 = vmatmul.msk.f32.vlgmr.msrb.gmra.mxu2 %vm108_vm0, %v751_v53 }
 0x7b2   :  { %v806_v7 = vpop.f32.mrf.mxu2 }
 0x7b3   :  { %2055 = vmatmul.msk.f32.vlgmr.msra.gmra.mxu0 %vm132_vm1, %v806_v7  ;;  %2056 = vmatmul.msk.f32.vlgmr.msrb.gmra.mxu1 %vm132_vm1, %v806_v7 }
 0x7b4   :  { %867 = vmatpush.msra.mxu3 %v806_v7  ;;  %2084 = vmatpush.msk.msrb.mxu1 %vm539_vm14, %v2639_v18 }
 0x7b5   :  { %2057 = vmatmul.msk.f32.vlgmr.msra.gmra.mxu3 %vm176_vm4, %v2466_v24 }
 0x7bb   :  { %2070 = vmatmul.msk.f32.vlgmr.msra.gmra.mxu1 %vm288_vm3, %v2458_v23 }
 0x7bd   :  { %2058 = vmatmul.msk.f32.gmra.mxu3 %vm176_vm4, %v2480_v26 }
 0x7c3   :  { %2071 = vmatmul.msk.f32.gmra.mxu1 %vm288_vm3, %v2471_v25 }
 0x7c5   :  { %2059 = vmatmul.msk.f32.gmra.mxu3 %vm176_vm4, %v2494_v28 }
 0x7cb   :  { %2072 = vmatmul.msk.f32.gmra.mxu1 %vm288_vm3, %v2485_v27 }
 0x7cd   :  { %2060 = vmatmul.msk.f32.gmra.mxu3 %vm176_vm4, %v2513_v31 }
 0x7d3   :  { %2073 = vmatmul.msk.f32.gmra.mxu1 %vm288_vm3, %v2499_v29 }
 0x830   :  { %v829_v9 = vpop.f32.mrf.mxu0  ;;  %v849_v10 = vpop.f32.mrf.mxu1 }
 0x831   :  { %896 = vmatpush.msra.mxu2 %v849_v10  ;;  %925 = vmatpush.msrb.mxu0 %v829_v9 }
 0x832   :  { %2061 = vmatmul.msk.f32.vlgmr.msra.gmra.mxu2 %vm176_vm4, %v2466_v24  ;;  %2065 = vmatmul.msk.f32.vlgmr.msrb.gmra.mxu0 %vm176_vm4, %v2508_v30 }
 0x838   :  { %v959_v24 = vpop.f32.mrf.mxu1 }
 0x83a   :  { %2062 = vmatmul.msk.f32.gmra.mxu2 %vm176_vm4, %v2480_v26  ;;  %2066 = vmatmul.msk.f32.gmra.mxu0 %vm176_vm4, %v2522_v34 }
 0x840   :  { %v962_v11 = vpop.f32.mrf.mxu1 }
 0x842   :  { %2063 = vmatmul.msk.f32.gmra.mxu2 %vm176_vm4, %v2494_v28  ;;  %2067 = vmatmul.msk.f32.gmra.mxu0 %vm176_vm4, %v2531_v35 }
 0x848   :  { %v965_v60 = vpop.f32.mrf.mxu1 }
 0x84a   :  { %2064 = vmatmul.msk.f32.gmra.mxu2 %vm176_vm4, %v2513_v31  ;;  %2068 = vmatmul.msk.f32.gmra.mxu0 %vm176_vm4, %v2540_v36 }
 0x850   :  { %v968_v20 = vpop.f32.mrf.mxu1 }
 0x8af   :  { %v927_v23 = vpop.f32.mrf.mxu0 }
 0x8b5   :  { %v898_v25 = vpop.f32.mrf.mxu2 }
 0x8b6   :  { %v928_v27 = vadd.f32 %v927_v23, %v898_v25 }
 0x8b7   :  { %v930_v29 = vpop.f32.mrf.mxu0 }
 0x8b8   :  { %v971_v26 = vadd.f32 %v959_v24, %v928_v27 }
 0x8ba   :  { %v979_v18 = vmul.f32 0.2, %v971_v26  ;;  %vm975_vm5 = vcmp.gt.f32.partialorder %v971_v26, 0.0 }
 0x8bc   :  { %v2846_v12 = vsel %vm975_vm5, %v971_v26, %v979_v18 }
 0x8bd   :  { %v901_v28 = vpop.f32.mrf.mxu2  ;;  %1025 = vperm.xlu1 %2174, %v2846_v12   ;;  %989 = vperm.xlu2 %2175, %v2846_v12  }
 0x8be   :  { %v931_v31 = vadd.f32 %v930_v29, %v901_v28 }
 0x8bf   :  { %v933_v15 = vpop.f32.mrf.mxu0 }
 0x8c0   :  { %v972_v13 = vadd.f32 %v962_v11, %v931_v31 }
 0x8c2   :  { %v980_v14 = vmul.f32 0.2, %v972_v13  ;;  %vm976_vm6 = vcmp.gt.f32.partialorder %v972_v13, 0.0 }
 0x8c4   :  { %v2850_v16 = vsel %vm976_vm6, %v972_v13, %v980_v14 }
 0x8c5   :  { %v904_v17 = vpop.f32.mrf.mxu2  ;;  %994 = vperm.xlu0 %2176, %v2850_v16   ;;  %2177 = vset.pattern.permute.xlu2 %v2296_v37 }
 0x8c6   :  { %v934_v47 = vadd.f32 %v933_v15, %v904_v17  ;;  %1029 = vperm.xlu2 %2177, %v2850_v16   ;;  %2178 = vset.pattern.permute.xlu1 %v2297_v38 }
 0x8c7   :  { %v936_v0 = vpop.f32.mrf.mxu0 }
 0x8c8   :  { %v973_v1 = vadd.f32 %v965_v60, %v934_v47 }
 0x8ca   :  { %v981_v3 = vmul.f32 0.2, %v973_v1  ;;  %vm977_vm7 = vcmp.gt.f32.partialorder %v973_v1, 0.0 }
 0x8cc   :  { %v2856_v2 = vsel %vm977_vm7, %v973_v1, %v981_v3 }
 0x8cd   :  { %999 = vperm.xlu1 %2178, %v2856_v2   ;;  %v907_v19 = vpop.f32.mrf.mxu2 }
 0x8ce   :  { %v937_v21 = vadd.f32 %v936_v0, %v907_v19  ;;  %2180 = vset.pattern.permute.xlu2 %v2297_v38 }
 0x8d0   :  { %v974_v22 = vadd.f32 %v968_v20, %v937_v21 }
 0x8d2   :  { %v982_v32 = vmul.f32 0.2, %v974_v22  ;;  %vm978_vm8 = vcmp.gt.f32.partialorder %v974_v22, 0.0 }
 0x8d4   :  { %v2860_v33 = vsel %vm978_vm8, %v974_v22, %v982_v32  ;;  %v2902_v32 = vpop.f32.mrf.mxu3 }
 0x8d5   :  { %2179 = vset.pattern.permute.xlu1 %v2296_v37  ;;  %1004 = vperm.xlu2 %2180, %v2860_v33  }
 0x8d6   :  { %1033 = vperm.xlu1 %2179, %v2856_v2  }
 0x8dd   :  { %2181 = vset.pattern.permute.xlu2 %v2296_v37 }
 0x8de   :  { %1037 = vperm.xlu2 %2181, %v2860_v33  }
 0x8e6   :  { %2183 = vset.pattern.permute.xlu2 %v2297_v38 }
 0x917   :  { %v990_v39 = vpop.permute.xlu2 %989 }
 0x918   :  { %v1007_v45 = vsel %vm76_vm11, %v990_v39, -1e+30  ;;  %v2904_v39 = vpop.f32.mrf.mxu3 }
 0x919   :  { %v1011_v51 = vsel %vm176_vm4, %v1007_v45, -inf }
 0x920   :  { %v1030_v40 = vpop.permute.xlu2 %1029 }
 0x921   :  { %v1041_v23 = vsel %vm77_vm9, %v1030_v40, -1e+30  ;;  %v2906_v40 = vpop.f32.mrf.mxu3 }
 0x922   :  { %v1045_v18 = vsel %vm176_vm4, %v1041_v23, -inf }
 0x92f   :  { %v1026_v41 = vpop.permute.xlu1 %1025  ;;  %v1005_v43 = vpop.permute.xlu2 %1004 }
 0x930   :  { %v1010_v46 = vsel %vm79_vm12, %v1005_v43, -1e+30  ;;  %v1040_v9 = vsel %vm76_vm11, %v1026_v41, -1e+30  ;;  %v2908_v41 = vpop.f32.mrf.mxu3 }
 0x931   :  { %v1014_v52 = vsel %vm176_vm4, %v1010_v46, -inf  ;;  %v1044_v25 = vsel %vm176_vm4, %v1040_v9, -inf }
 0x932   :  { %v1048_v31 = vmax.f32 %v1044_v25, %v1045_v18 }
 0x937   :  { %v995_v42 = vpop.permute.xlu0 %994 }
 0x938   :  { %v1008_v44 = vsel %vm77_vm9, %v995_v42, -1e+30  ;;  %v1038_v7 = vpop.permute.xlu2 %1037 }
 0x939   :  { %v1012_v48 = vsel %vm176_vm4, %v1008_v44, -inf  ;;  %v1043_v24 = vsel %vm79_vm12, %v1038_v7, -1e+30 }
 0x93a   :  { %v1015_v55 = vmax.f32 %v1011_v51, %v1012_v48  ;;  %v1047_v11 = vsel %vm176_vm4, %v1043_v24, -inf }
 0x93f   :  { %v1000_v49 = vpop.permute.xlu1 %999 }
 0x940   :  { %v1009_v50 = vsel %vm78_vm10, %v1000_v49, -1e+30 }
 0x941   :  { %v1013_v53 = vsel %vm176_vm4, %v1009_v50, -inf }
 0x942   :  { %v1016_v4 = vmax.f32 %v1013_v53, %v1014_v52 }
 0x944   :  { %v1017_v8 = vmax.f32 %v1015_v55, %v1016_v4 }
 0x946   :  { %v1018_v10 = vrot.slane %v1017_v8, 4 }
 0x948   :  { %v1034_v27 = vpop.permute.xlu1 %1033  ;;  %v1019_v26 = vmax.f32 %v1017_v8, %v1018_v10 }
 0x949   :  { %v1042_v29 = vsel %vm78_vm10, %v1034_v27, -1e+30 }
 0x94a   :  { %v1046_v28 = vsel %vm176_vm4, %v1042_v29, -inf  ;;  %v1020_v14 = vrot.slane %v1019_v26, 2 }
 0x94b   :  { %v1049_v13 = vmax.f32 %v1046_v28, %v1047_v11 }
 0x94c   :  { %v1021_v60 = vmax.f32 %v1019_v26, %v1020_v14 }
 0x94d   :  { %v1050_v15 = vmax.f32 %v1048_v31, %v1049_v13 }
 0x94e   :  { %v1022_v3 = vrot.slane %v1021_v60, 1 }
 0x94f   :  { %v1051_v17 = vrot.slane %v1050_v15, 4 }
 0x950   :  { %v1023_v20 = vmax.f32 %v1021_v60, %v1022_v3 }
 0x951   :  { %v1052_v47 = vmax.f32 %v1050_v15, %v1051_v17 }
 0x953   :  { %v1053_v1 = vrot.slane %v1052_v47, 2 }
 0x955   :  { %v1054_v0 = vmax.f32 %v1052_v47, %v1053_v1 }
 0x957   :  { %v1055_v19 = vrot.slane %v1054_v0, 1 }
 0x959   :  { %v1056_v21 = vmax.f32 %v1054_v0, %v1055_v19 }
 0x95b   :  { %v1057_v22 = vsel %vm420_vm13, %v1023_v20, %v1056_v21 }
 0x95c   :  { %2074 = vmatpush.xpose.msk.msrb.mxu3 %vm176_vm4, %v1057_v22 }
 0x95f   :  { %2075 = vmatmul.msk.f32.vlgmr.msrb.gmra.mxu3 %vm176_vm4, %v2508_v30 }
 0x967   :  { %2076 = vmatmul.msk.f32.gmra.mxu3 %vm176_vm4, %v2522_v34 }
 0x96f   :  { %2077 = vmatmul.msk.f32.gmra.mxu3 %vm176_vm4, %v2531_v35 }
 0x977   :  { %2078 = vmatmul.msk.f32.gmra.mxu3 %vm176_vm4, %v2540_v36 }
 0x9e2   :  { %v1078_v42 = vpop.f32.mrf.mxu3 }
 0x9e3   :  { %v1090_v50 = vsub.f32 %v2846_v12, %v1078_v42 }
 0x9e5   :  { %v1094_v55 = vmul.f32 1.442695, %v1090_v50 }
 0x9ea   :  { %v1081_v43 = vpop.f32.mrf.mxu3 }
 0x9eb   :  { %v1091_v48 = vsub.f32 %v2850_v16, %v1081_v43 }
 0x9ed   :  { %v1096_v53 = vmul.f32 1.442695, %v1091_v48 }
 0x9f2   :  { %v1084_v44 = vpop.f32.mrf.mxu3 }
 0x9f3   :  { %v1092_v45 = vsub.f32 %v2856_v2, %v1084_v44  ;;  %v2935_v44 = vld [vmem:[%s3287_s4 + $0x18] sm:$0xff] }
 0x9f5   :  { %v1098_v51 = vmul.f32 1.442695, %v1092_v45 }
 0x9fa   :  { %v1087_v46 = vpop.f32.mrf.mxu3 }
 0x9fb   :  { %v1093_v49 = vsub.f32 %v2860_v33, %v1087_v46  ;;  %v2941_v46 = vld [vmem:[%s3287_s4 + $0x10] sm:$0xff] }
 0x9fd   :  { %v1100_v52 = vmul.f32 1.442695, %v1093_v49  ;;  %v2947_v49 = vld [vmem:[%s3287_s4 + $0x8] sm:$0xff] }
 0x9ff   :  { %2214 = vpow2.f32 %v1100_v52 }
 0xa00   :  { %2216 = vpow2.f32 %v1098_v51 }
 0xa01   :  { %2218 = vpow2.f32 %v1096_v53 }
 0xa02   :  { %2220 = vpow2.f32 %v1094_v55 }
 0xa05   :  { %v2215_v4 = vpop.eup %2214 }
 0xa06   :  { %1114 = vmatpush.msrb.mxu2 %v2215_v4  ;;  %v2217_v7 = vpop.eup %2216 }
 0xa07   :  { %v2219_v2 = vpop.eup %2218 }
 0xa08   :  { %1115 = vmatpush.msrb.mxu2 %v2217_v7  ;;  %v2221_v8 = vpop.eup %2220 }
 0xa0a   :  { %1116 = vmatpush.msrb.mxu2 %v2219_v2 }
 0xa0c   :  { %1117 = vmatpush.msrb.mxu2 %v2221_v8 }
 0xa0d   :  { %2079 = vmatmul.msk.f32.vlgmr.msrb.gmra.mxu2 %vm108_vm0, %v2624_v54 }
 0xa90   :  { %v1119_v12 = vpop.f32.mrf.mxu2 }
 0xa91   :  { %1137 = vmatpush.msra.mxu0 %v1119_v12 }
 0xa92   :  { %2080 = vmatmul.msk.f32.vlgmr.msra.gmra.mxu0 %vm176_vm4, %v2508_v30 }
 0xa9a   :  { %2081 = vmatmul.msk.f32.gmra.mxu0 %vm176_vm4, %v2522_v34 }
 0xaa2   :  { %2082 = vmatmul.msk.f32.gmra.mxu0 %vm176_vm4, %v2531_v35 }
 0xaaa   :  { %2083 = vmatmul.msk.f32.gmra.mxu0 %vm176_vm4, %v2540_v36 }
 0xb0f   :  { %v1139_v16 = vpop.f32.mrf.mxu0 }
 0xb10   :  { %v1140_v33 = vadd.f32 1e-16, %v1139_v16 }
 0xb12   :  { %2222 = vrcp.f32 %v1140_v33 }
 0xb17   :  { %v1142_v9 = vpop.f32.mrf.mxu0 }
 0xb18   :  { %v2223_v10 = vpop.eup %2222  ;;  %v1143_v23 = vadd.f32 1e-16, %v1142_v9 }
 0xb19   :  { %v1155_v24 = vmul.f32 %v2223_v10, %v2221_v8 }
 0xb1a   :  { %2224 = vrcp.f32 %v1143_v23 }
 0xb1b   :  { %2085 = vmatmul.msk.f32.vlgmr.msrb.gmra.mxu1 %vm526_vm15, %v1155_v24  ;;  %v1247_v47 = vsel %vm526_vm15, %v1155_v24, 0.0 }
 0xb1f   :  { %v1145_v25 = vpop.f32.mrf.mxu0 }
 0xb20   :  { %v2225_v27 = vpop.eup %2224  ;;  %v1146_v26 = vadd.f32 1e-16, %v1145_v25 }
 0xb21   :  { %v1156_v29 = vmul.f32 %v2225_v27, %v2219_v2  ;;  %v2100_v27 = vld [vmem:[%s3288_s5 + $0x58] sm:$0xff] }
 0xb22   :  { %2226 = vrcp.f32 %v1146_v26  ;;  %1424 = vmatpush.msrb.mxu0 %v2100_v27  ;;  %v2099_v26 = vld [vmem:[%s3288_s5 + $0x50] sm:$0xff] }
 0xb23   :  { %2086 = vmatmul.msk.f32.gmra.mxu1 %vm526_vm15, %v1156_v29  ;;  %v1250_v18 = vsel %vm526_vm15, %v1156_v29, 0.0  ;;  %v2098_v29 = vld [vmem:[%s3288_s5 + $0x48] sm:$0xff] }
 0xb24   :  { %1251 = vadd.xlane.f32.xlu2 %v1250_v18  ;;  %1425 = vmatpush.msrb.mxu0 %v2099_v26  ;;  %v2097_v18 = vld [vmem:[%s3288_s5 + $0x40] sm:$0xff] }
 0xb26   :  { %1426 = vmatpush.msrb.mxu0 %v2098_v29 }
 0xb27   :  { %v1148_v11 = vpop.f32.mrf.mxu0 }
 0xb28   :  { %v2227_v28 = vpop.eup %2226  ;;  %v1149_v31 = vadd.f32 1e-16, %v1148_v11  ;;  %1427 = vmatpush.msrb.mxu0 %v2097_v18  ;;  %v2108_v11 = vld [vmem:[%s3289_s6 + $0xb8] sm:$0xff] }
 0xb29   :  { %v1157_v13 = vmul.f32 %v2227_v28, %v2217_v7  ;;  %v2116_v28 = vld [vmem:[%s3290_s7 + $0xb8] sm:$0xff]  ;;  %1443 = vmatpush.msra.mxu1 %v2108_v11 }
 0xb2a   :  { %2228 = vrcp.f32 %v1149_v31  ;;  %v2107_v31 = vld [vmem:[%s3289_s6 + $0xb0] sm:$0xff] }
 0xb2b   :  { %2087 = vmatmul.msk.f32.gmra.mxu1 %vm526_vm15, %v1157_v13  ;;  %v1253_v14 = vsel %vm526_vm15, %v1157_v13, 0.0  ;;  %v2115_v13 = vld [vmem:[%s3290_s7 + $0xb0] sm:$0xff] }
 0xb2c   :  { %1254 = vadd.xlane.f32.xlu1 %v1253_v14  ;;  %v2106_v14 = vld [vmem:[%s3289_s6 + $0xa8] sm:$0xff]  ;;  %1444 = vmatpush.msra.mxu1 %v2107_v31 }
 0xb2e   :  { %1445 = vmatpush.msra.mxu1 %v2106_v14 }
 0xb30   :  { %v2229_v15 = vpop.eup %2228 }
 0xb31   :  { %v1158_v17 = vmul.f32 %v2229_v15, %v2215_v4  ;;  %v2954_v4 = vld [vmem:[%s3287_s4] sm:$0xff]  ;;  %v2114_v15 = vld [vmem:[%s3290_s7 + $0xa8] sm:$0xff] }
 0xb33   :  { %2088 = vmatmul.msk.f32.gmra.mxu1 %vm526_vm15, %v1158_v17  ;;  %v1256_v60 = vsel %vm526_vm15, %v1158_v17, 0.0 }
 0xb34   :  { %1257 = vadd.xlane.f32.xlu0 %v1256_v60 }
 0xb3c   :  { %1248 = vadd.xlane.f32.xlu0 %v1247_v47  ;;  %v2105_v47 = vld [vmem:[%s3289_s6 + $0xa0] sm:$0xff] }
 0xb3d   :  { %1446 = vmatpush.msra.mxu1 %v2105_v47 }
 0xb97   :  { %v1252_v19 = vpop.xlane.xlu2 %1251 }
 0xb98   :  { %v1188_v1 = vpop.f32.mrf.mxu1  ;;  %v1260_v43 = vmul.f32 0.5, %v1252_v19  ;;  %v2112_v19 = vld [vmem:[%s3290_s7 + $0x98] sm:$0xff] }
 0xb99   :  { %v1200_v12 = vmul.f32 %v1188_v1, %v2902_v32  ;;  %v2190_v32 = vld [vmem:[%s3294_s11 + $0x1] ss:$0 sm:$0xff] }
 0xb9a   :  { %v1264_v50 = vmul.f32 %v2947_v49, %v1260_v43  ;;  %v2113_v1 = vld [vmem:[%s3290_s7 + $0xa0] sm:$0xff] }
 0xb9f   :  { %v1255_v0 = vpop.xlane.xlu1 %1254 }
 0xba0   :  { %v1191_v3 = vpop.f32.mrf.mxu1  ;;  %v1261_v21 = vmul.f32 0.5, %v1255_v0  ;;  %v2104_v0 = vld [vmem:[%s3289_s6 + $0x98] sm:$0xff] }
 0xba1   :  { %v1201_v8 = vmul.f32 %v1191_v3, %v2904_v39  ;;  %1447 = vmatpush.msra.mxu1 %v2104_v0 }
 0xba2   :  { %v1265_v48 = vmul.f32 %v2941_v46, %v1261_v21  ;;  %v2102_v21 = vld [vmem:[%s3289_s6 + $0x88] sm:$0xff] }
 0xba7   :  { %v1258_v20 = vpop.xlane.xlu0 %1257 }
 0xba8   :  { %v1262_v22 = vmul.f32 0.5, %v1258_v20  ;;  %v1194_v42 = vpop.f32.mrf.mxu1  ;;  %v2111_v20 = vld [vmem:[%s3290_s7 + $0x90] sm:$0xff] }
 0xba9   :  { %v1202_v2 = vmul.f32 %v1194_v42, %v2906_v40 }
 0xbaa   :  { %v1266_v45 = vmul.f32 %v2935_v44, %v1262_v22  ;;  %v2110_v22 = vld [vmem:[%s3290_s7 + $0x88] sm:$0xff] }
 0xbac   :  { %1279 = vmatpush.msra.mxu3 %v1266_v45 }
 0xbae   :  { %1280 = vmatpush.msra.mxu3 %v1265_v48 }
 0xbaf   :  { %v1249_v51 = vpop.xlane.xlu0 %1248 }
 0xbb0   :  { %v1259_v52 = vmul.f32 0.5, %v1249_v51  ;;  %v1197_v53 = vpop.f32.mrf.mxu1  ;;  %1281 = vmatpush.msra.mxu3 %v1264_v50 }
 0xbb1   :  { %v1203_v55 = vmul.f32 %v1197_v53, %v2908_v41 }
 0xbb2   :  { %v1263_v7 = vmul.f32 %v2954_v4, %v1259_v52  ;;  %v2191_v52 = vld [vmem:[%s3295_s12 + $0x1] ss:$0 sm:$0xff]  ;;  %s1977_s12 = sshll.u32 %s3299_s16, 4  ;;  %s1978_s12 = int_to_ptr.hbm [resolvable:$true] %s1977_s12 }
 0xbb3   :  { %1216 = vmatpush.msra.mxu2 %v1203_v55 }
 0xbb4   :  { %1282 = vmatpush.msra.mxu3 %v1263_v7  ;;  %v2192_v7 = vld [vmem:[%s3296_s13 + $0x1] ss:$0 sm:$0xff] }
 0xbb5   :  { %1217 = vmatpush.msra.mxu2 %v1202_v2  ;;  %2091 = vmatmul.msk.f32.vlgmr.msra.gmra.mxu3 %vm108_vm0, %v2624_v54 }
 0xbb7   :  { %1218 = vmatpush.msra.mxu2 %v1201_v8 }
 0xbb9   :  { %1219 = vmatpush.msra.mxu2 %v1200_v12  ;;  %v2101_v12 = vld [vmem:[%s3289_s6 + $0x80] sm:$0xff] }
 0xbba   :  { %2089 = vmatmul.msk.f32.vlgmr.msra.gmra.mxu2 %vm108_vm0, %v2624_v54  ;;  %v2051_v54 = vld [vmem:[%s3292_s9 + $0x38] sm:$0xff] }
 0xbbb   :  { %1235 = vmatpush.msrb.mxu2 %v2654_v57  ;;  %v2050_v57 = vld [vmem:[%s3292_s9 + $0x30] sm:$0xff]  ;;  %1328 = vmatpush.msrb.mxu3 %v2051_v54  ;;  %v2109_v54 = vld [vmem:[%s3290_s7 + $0x80] sm:$0xff] }
 0xbbd   :  { %1236 = vmatpush.msrb.mxu2 %v2659_v58  ;;  %v2049_v58 = vld [vmem:[%s3292_s9 + $0x28] sm:$0xff]  ;;  %1329 = vmatpush.msrb.mxu3 %v2050_v57 }
 0xbbf   :  { %1237 = vmatpush.msrb.mxu2 %v2665_v59  ;;  %1330 = vmatpush.msrb.mxu3 %v2049_v58  ;;  %v2252_v58 = vld [vmem:[%s3284_s1] sm:$0xff] }
 0xbc1   :  { %1238 = vmatpush.msrb.mxu2 %v2671_v61 }
 0xbc3   :  { %1239 = vmatpush.msrb.mxu2 %v2677_v62  ;;  %v2052_v62 = vld [vmem:[%s3293_s10 + $0x4] sm:$0xf] }
 0xbc5   :  { %1240 = vmatpush.msrb.mxu2 %v2683_v5  ;;  %v2048_v5 = vld [vmem:[%s3292_s9 + $0x20] sm:$0xff] }
 0xbc6   :  { %1331 = vmatpush.msrb.mxu3 %v2048_v5  ;;  %v2117_v5 = vld [vmem:[%s3291_s8 + $0x8] sm:$0xf] }
 0xbc7   :  { %1241 = vmatpush.msrb.mxu2 %v2689_v6 }
 0xbc9   :  { %1242 = vmatpush.msrb.mxu2 %v2708_v63 }
 0xbcb   :  { %2092 = vmatpush.msk.msra.mxu2 %vm301_vm2, %v2052_v62  ;;  %v2255_v62 = vld [vmem:[%s3284_s1 + $0x18] sm:$0xff] }
 0xc38   :  { %v1284_v61 = vpop.f32.mrf.mxu3 }
 0xc3d   :  { %v1221_v59 = vpop.f32.mrf.mxu2 }
 0xc3e   :  { %2090 = vmatmul.msk.f32.vlgmr.msrb.gmra.mxu2 %vm132_vm1, %v1221_v59  ;;  %v2253_v59 = vld [vmem:[%s3284_s1 + $0x8] sm:$0xff] }
 0xc3f   :  { %1463 = vmatpush.msrb.mxu2 %v2116_v28 }
 0xc41   :  { %1464 = vmatpush.msrb.mxu2 %v2115_v13 }
 0xc43   :  { %1465 = vmatpush.msrb.mxu2 %v2114_v15 }
 0xc45   :  { %1466 = vmatpush.msrb.mxu2 %v2113_v1 }
 0xc46   :  { %2093 = vmatmul.msk.f32.vlgmr.msra.gmra.mxu2 %vm288_vm3, %v1284_v61  ;;  %v2254_v61 = vld [vmem:[%s3284_s1 + $0x10] sm:$0xff] }
 0xc47   :  { %1467 = vmatpush.msrb.mxu2 %v2112_v19 }
 0xc49   :  { %1468 = vmatpush.msrb.mxu2 %v2111_v20 }
 0xc4b   :  { %1469 = vmatpush.msrb.mxu2 %v2110_v22 }
 0xc4d   :  { %1470 = vmatpush.msrb.mxu2 %v2109_v54 }
 0xc4f   :  { %2139 = vmatpush.msk.msra.mxu2 %vm301_vm2, %v2117_v5 }
 0xcc1   :  { %v1244_v6 = vpop.f32.mrf.mxu2 }
 0xcc2   :  { %2094 = vmatmul.msk.f32.vlgmr.msrb.gmra.mxu3 %vm108_vm0, %v1244_v6 }
 0xcc9   :  { %v1310_v63 = vpop.f32.mrf.mxu2 }
 0xd45   :  { %v1333_v39 = vpop.f32.mrf.mxu3 }
 0xd46   :  { %v1334_v40 = vadd.f32 %v1333_v39, %v1310_v63  ;;  %v3098_v63 = vld [vmem:[%s3285_s2] sm:$0xff]  ;;  %v3106_v39 = vld [vmem:[%s3285_s2 + $0x8] sm:$0xff] }
 0xd48   :  { %v1339_v41 = vadd.f32 %v2190_v32, %v1334_v40  ;;  %v3114_v40 = vld [vmem:[%s3285_s2 + $0x10] sm:$0xff] }
 0xd4a   :  { %v1340_v16 = vmax.f32 %v1339_v41, 0.0  ;;  %v3122_v41 = vld [vmem:[%s3285_s2 + $0x18] sm:$0xff] }
 0xd4c   :  { %v1341_v33 = vsel %vm108_vm0, %v1340_v16, 0.0 }
 0xd4d   :  { %1342 = vadd.xlane.f32.xlu1 %v1341_v33 }
 0xdc0   :  { %v1343_v9 = vpop.xlane.xlu1 %1342 }
 0xdc1   :  { %v1344_v10 = vmul.f32 %v1343_v9, %v2734_v56 }
 0xdc3   :  { %v1345_v23 = vsub.f32 %v1340_v16, %v1344_v10 }
 0xdc5   :  { %v1346_v24 = vmul.f32 %v1345_v23, %v1345_v23 }
 0xdc7   :  { %v1347_v25 = vsel %vm108_vm0, %v1346_v24, 0.0 }
 0xdc8   :  { %1348 = vadd.xlane.f32.xlu2 %v1347_v25 }
 0xe3b   :  { %v1349_v17 = vpop.xlane.xlu2 %1348 }
 0xe3c   :  { %v1350_v60 = vmul.f32 %v1349_v17, %v2734_v56  ;;  %v2103_v56 = vld [vmem:[%s3289_s6 + $0x90] sm:$0xff] }
 0xe3d   :  { %1448 = vmatpush.msra.mxu1 %v2103_v56 }
 0xe3e   :  { %v1351_v3 = vadd.f32 1e-05, %v1350_v60 }
 0xe3f   :  { %1449 = vmatpush.msra.mxu1 %v2102_v21 }
 0xe40   :  { %2230 = vrsqrt.f32 %v1351_v3  ;;  %vm1358_vm6 = vweird.f32 %v1351_v3 }
 0xe41   :  { %1450 = vmatpush.msra.mxu1 %v2101_v12 }
 0xe46   :  { %v2231_v42 = vpop.eup %2230 }
 0xe47   :  { %v1353_v43 = vmul.f32 %v2231_v42, %v1351_v3  ;;  %vm1359_vm5 = vweird.f32 %v2231_v42 }
 0xe48   :  { %vm1360_vm7 = vmor %vm1358_vm6, %vm1359_vm5 }
 0xe49   :  { %v1354_v45 = vmul.f32 %v2231_v42, %v1353_v43 }
 0xe4b   :  { %v1355_v48 = vmul.f32 0.5, %v1354_v45 }
 0xe4d   :  { %v1356_v50 = vsub.f32 1.5, %v1355_v48 }
 0xe4f   :  { %v1357_v51 = vmul.f32 %v2231_v42, %v1356_v50 }
 0xe51   :  { %v1361_v53 = vsel %vm1360_vm7, %v2231_v42, %v1357_v51 }
 0xe52   :  { %v1362_v55 = vmul.f32 %v1361_v53, %v1345_v23 }
 0xe54   :  { %v1368_v2 = vmul.f32 %v2191_v52, %v1362_v55 }
 0xe56   :  { %v1374_v8 = vadd.f32 %v2192_v7, %v1368_v2 }
 0xe58   :  { %2124 = vmatmul.msk.f32.vlgmr.msrb.gmra.mxu0 %vm108_vm0, %v1374_v8 }
 0xed5   :  { %v1429_v57 = vpop.f32.mrf.mxu0 }
 0xed6   :  { %2125 = vmatmul.msk.f32.vlgmr.msra.gmra.mxu1 %vm132_vm1, %v1429_v57  ;;  %2126 = vmatmul.msk.f32.vlgmr.msrb.gmra.mxu2 %vm132_vm1, %v1429_v57 }
 0xed7   :  { %1490 = vmatpush.msra.mxu3 %v1429_v57 }
 0xed8   :  { %2127 = vmatmul.msk.f32.vlgmr.msra.gmra.mxu3 %vm176_vm4, %v2252_v58 }
 0xede   :  { %2140 = vmatmul.msk.f32.vlgmr.msra.gmra.mxu2 %vm288_vm3, %v2954_v4 }
 0xee0   :  { %2128 = vmatmul.msk.f32.gmra.mxu3 %vm176_vm4, %v2253_v59 }
 0xee6   :  { %2141 = vmatmul.msk.f32.gmra.mxu2 %vm288_vm3, %v2947_v49 }
 0xee8   :  { %2129 = vmatmul.msk.f32.gmra.mxu3 %vm176_vm4, %v2254_v61 }
 0xeee   :  { %2142 = vmatmul.msk.f32.gmra.mxu2 %vm288_vm3, %v2941_v46 }
 0xef0   :  { %2130 = vmatmul.msk.f32.gmra.mxu3 %vm176_vm4, %v2255_v62 }
 0xef6   :  { %2143 = vmatmul.msk.f32.gmra.mxu2 %vm288_vm3, %v2935_v44 }
 0xf53   :  { %v1452_v6 = vpop.f32.mrf.mxu1 }
 0xf54   :  { %1548 = vmatpush.msrb.mxu1 %v1452_v6 }
 0xf55   :  { %2135 = vmatmul.msk.f32.vlgmr.msrb.gmra.mxu1 %vm176_vm4, %v3098_v63 }
 0xf59   :  { %v1472_v32 = vpop.f32.mrf.mxu2 }
 0xf5a   :  { %1519 = vmatpush.msra.mxu0 %v1472_v32 }
 0xf5b   :  { %2131 = vmatmul.msk.f32.vlgmr.msra.gmra.mxu0 %vm176_vm4, %v2252_v58 }
 0xf5d   :  { %2136 = vmatmul.msk.f32.gmra.mxu1 %vm176_vm4, %v3106_v39 }
 0xf61   :  { %v1582_v33 = vpop.f32.mrf.mxu2 }
 0xf63   :  { %2132 = vmatmul.msk.f32.gmra.mxu0 %vm176_vm4, %v2253_v59 }
 0xf65   :  { %2137 = vmatmul.msk.f32.gmra.mxu1 %vm176_vm4, %v3114_v40 }
 0xf69   :  { %v1585_v25 = vpop.f32.mrf.mxu2 }
 0xf6b   :  { %2133 = vmatmul.msk.f32.gmra.mxu0 %vm176_vm4, %v2254_v61 }
 0xf6d   :  { %2138 = vmatmul.msk.f32.gmra.mxu1 %vm176_vm4, %v3122_v41 }
 0xf71   :  { %v1588_v13 = vpop.f32.mrf.mxu2 }
 0xf73   :  { %2134 = vmatmul.msk.f32.gmra.mxu0 %vm176_vm4, %v2255_v62 }
 0xf79   :  { %v1591_v19 = vpop.f32.mrf.mxu2 }
 0xfd2   :  { %v1550_v16 = vpop.f32.mrf.mxu1 }
 0xfd8   :  { %v1521_v9 = vpop.f32.mrf.mxu0 }
 0xfd9   :  { %v1551_v10 = vadd.f32 %v1550_v16, %v1521_v9 }
 0xfda   :  { %v1553_v23 = vpop.f32.mrf.mxu1 }
 0xfdb   :  { %v1594_v24 = vadd.f32 %v1582_v33, %v1551_v10 }
 0xfdd   :  { %v1602_v27 = vmul.f32 0.2, %v1594_v24  ;;  %vm1598_vm8 = vcmp.gt.f32.partialorder %v1594_v24, 0.0 }
 0xfdf   :  { %v3127_v26 = vsel %vm1598_vm8, %v1594_v24, %v1602_v27 }
 0xfe0   :  { %v1524_v29 = vpop.f32.mrf.mxu0  ;;  %1648 = vperm.xlu1 %2179, %v3127_v26   ;;  %1612 = vperm.xlu0 %2176, %v3127_v26  }
 0xfe1   :  { %v1554_v18 = vadd.f32 %v1553_v23, %v1524_v29 }
 0xfe2   :  { %v1556_v28 = vpop.f32.mrf.mxu1 }
 0xfe3   :  { %v1595_v11 = vadd.f32 %v1585_v25, %v1554_v18 }
 0xfe5   :  { %v1603_v31 = vmul.f32 0.2, %v1595_v11  ;;  %vm1599_vm5 = vcmp.gt.f32.partialorder %v1595_v11, 0.0 }
 0xfe7   :  { %v3131_v14 = vsel %vm1599_vm5, %v1595_v11, %v1603_v31 }
 0xfe8   :  { %v1527_v15 = vpop.f32.mrf.mxu0  ;;  %2182 = vset.pattern.permute.xlu1 %v2297_v38 }
 0xfe9   :  { %v1557_v17 = vadd.f32 %v1556_v28, %v1527_v15  ;;  %1617 = vperm.xlu1 %2182, %v3131_v14  }
 0xfea   :  { %v1559_v1 = vpop.f32.mrf.mxu1 }
 0xfeb   :  { %v1596_v60 = vadd.f32 %v1588_v13, %v1557_v17  ;;  %v3181_v17 = vpop.f32.mrf.mxu3 }
 0xfed   :  { %v1604_v47 = vmul.f32 0.2, %v1596_v60  ;;  %vm1600_vm6 = vcmp.gt.f32.partialorder %v1596_v60, 0.0 }
 0xfef   :  { %v3135_v3 = vsel %vm1600_vm6, %v1596_v60, %v1604_v47 }
 0xff0   :  { %v1530_v0 = vpop.f32.mrf.mxu0  ;;  %1622 = vperm.xlu2 %2183, %v3135_v3  }
 0xff1   :  { %v1560_v56 = vadd.f32 %v1559_v1, %v1530_v0  ;;  %2186 = vset.pattern.permute.xlu1 %v2296_v37 }
 0xff3   :  { %v1597_v20 = vadd.f32 %v1591_v19, %v1560_v56  ;;  %v3183_v60 = vpop.f32.mrf.mxu3 }
 0xff5   :  { %v1605_v21 = vmul.f32 0.2, %v1597_v20  ;;  %vm1601_vm7 = vcmp.gt.f32.partialorder %v1597_v20, 0.0 }
 0xff7   :  { %v3139_v38 = vsel %vm1601_vm7, %v1597_v20, %v1605_v21 }
 0xff8   :  { %2185 = vset.pattern.permute.xlu2 %v2296_v37  ;;  %1660 = vperm.xlu1 %2186, %v3139_v38  }
 0xff9   :  { %1627 = vperm.xlu0 %2176, %v3139_v38   ;;  %1656 = vperm.xlu2 %2185, %v3135_v3  }
 0xffb   :  { %v3185_v47 = vpop.f32.mrf.mxu3 }
0x1001   :  { %2184 = vset.pattern.permute.xlu0 %v2296_v37 }
0x1002   :  { %1652 = vperm.xlu0 %2184, %v3131_v14  }
0x1003   :  { %v3187_v1 = vpop.f32.mrf.mxu3 }
0x104a   :  { %v1623_v45 = vpop.permute.xlu2 %1622 }
0x104b   :  { %v1632_v50 = vsel %vm78_vm10, %v1623_v45, -1e+30 }
0x104c   :  { %v1636_v55 = vsel %vm176_vm4, %v1632_v50, -inf }
0x1052   :  { %v1649_v22 = vpop.permute.xlu1 %1648  ;;  %v1613_v42 = vpop.permute.xlu0 %1612 }
0x1053   :  { %v1630_v51 = vsel %vm76_vm11, %v1613_v42, -1e+30  ;;  %v1657_v57 = vpop.permute.xlu2 %1656  ;;  %v1663_v62 = vsel %vm76_vm11, %v1649_v22, -1e+30 }
0x1054   :  { %v1634_v7 = vsel %vm176_vm4, %v1630_v51, -inf  ;;  %v1665_v5 = vsel %vm78_vm10, %v1657_v57, -1e+30  ;;  %v1667_v9 = vsel %vm176_vm4, %v1663_v62, -inf }
0x1055   :  { %v1669_v10 = vsel %vm176_vm4, %v1665_v5, -inf }
0x105b   :  { %v1618_v43 = vpop.permute.xlu1 %1617 }
0x105c   :  { %v1631_v48 = vsel %vm77_vm9, %v1618_v43, -1e+30 }
0x105d   :  { %v1635_v52 = vsel %vm176_vm4, %v1631_v48, -inf }
0x105e   :  { %v1638_v8 = vmax.f32 %v1634_v7, %v1635_v52 }
0x106a   :  { %v1661_v12 = vpop.permute.xlu1 %1660 }
0x106b   :  { %v1628_v53 = vpop.permute.xlu0 %1627  ;;  %v1666_v59 = vsel %vm79_vm12, %v1661_v12, -1e+30 }
0x106c   :  { %v1633_v37 = vsel %vm79_vm12, %v1628_v53, -1e+30  ;;  %v1670_v6 = vsel %vm176_vm4, %v1666_v59, -inf }
0x106d   :  { %v1637_v2 = vsel %vm176_vm4, %v1633_v37, -inf  ;;  %v1672_v23 = vmax.f32 %v1669_v10, %v1670_v6 }
0x106e   :  { %v1639_v54 = vmax.f32 %v1636_v55, %v1637_v2 }
0x1070   :  { %v1640_v58 = vmax.f32 %v1638_v8, %v1639_v54 }
0x1072   :  { %v1641_v61 = vrot.slane %v1640_v58, 4 }
0x1074   :  { %v1653_v32 = vpop.permute.xlu0 %1652  ;;  %v1642_v16 = vmax.f32 %v1640_v58, %v1641_v61 }
0x1075   :  { %v1664_v33 = vsel %vm77_vm9, %v1653_v32, -1e+30 }
0x1076   :  { %v1668_v36 = vsel %vm176_vm4, %v1664_v33, -inf  ;;  %v1643_v30 = vrot.slane %v1642_v16, 2 }
0x1077   :  { %v1671_v24 = vmax.f32 %v1667_v9, %v1668_v36 }
0x1078   :  { %v1644_v35 = vmax.f32 %v1642_v16, %v1643_v30 }
0x1079   :  { %v1673_v25 = vmax.f32 %v1671_v24, %v1672_v23 }
0x107a   :  { %v1645_v11 = vrot.slane %v1644_v35, 1 }
0x107b   :  { %v1674_v27 = vrot.slane %v1673_v25, 4 }
0x107c   :  { %v1646_v13 = vmax.f32 %v1644_v35, %v1645_v11 }
0x107d   :  { %v1675_v29 = vmax.f32 %v1673_v25, %v1674_v27 }
0x107f   :  { %v1676_v18 = vrot.slane %v1675_v29, 2 }
0x1081   :  { %v1677_v28 = vmax.f32 %v1675_v29, %v1676_v18 }
0x1083   :  { %v1678_v31 = vrot.slane %v1677_v28, 1 }
0x1085   :  { %v1679_v34 = vmax.f32 %v1677_v28, %v1678_v31 }
0x1087   :  { %v1680_v15 = vsel %vm420_vm13, %v1646_v13, %v1679_v34 }
0x1088   :  { %2144 = vmatpush.xpose.msk.msrb.mxu3 %vm176_vm4, %v1680_v15 }
0x108b   :  { %2145 = vmatmul.msk.f32.vlgmr.msrb.gmra.mxu3 %vm176_vm4, %v3098_v63 }
0x1093   :  { %2146 = vmatmul.msk.f32.gmra.mxu3 %vm176_vm4, %v3106_v39 }
0x109b   :  { %2147 = vmatmul.msk.f32.gmra.mxu3 %vm176_vm4, %v3114_v40 }
0x10a3   :  { %2148 = vmatmul.msk.f32.gmra.mxu3 %vm176_vm4, %v3122_v41 }
0x110e   :  { %v1701_v0 = vpop.f32.mrf.mxu3 }
0x110f   :  { %v1713_v43 = vsub.f32 %v3127_v26, %v1701_v0  ;;  %v3196_v26 = vld [vmem:[%s3286_s3] sm:$0xff] }
0x1111   :  { %v1717_v51 = vmul.f32 1.442695, %v1713_v43  ;;  %v2118_v43 = vld [vmem:[%s3292_s9 + $0x40] sm:$0xff] }
0x1116   :  { %v1704_v19 = vpop.f32.mrf.mxu3 }
0x1117   :  { %v1714_v22 = vsub.f32 %v3131_v14, %v1704_v19  ;;  %v2261_v14 = vld [vmem:[%s3297_s14] sm:$0x3]  ;;  %v2268_v19 = vld [vmem:[%s3298_s15 + $0x8] sm:$0xff]  ;;  %s2300_s14 = smov [#allocation2]  }
0x1118   :  { %s1975_s29 = sshll.u32 %s2300_s14, 4  ;;  %s1976_s29 = int_to_ptr.vmem [resolvable:$true] %s1975_s29 }
0x1119   :  { %v1719_v50 = vmul.f32 1.442695, %v1714_v22  ;;  %v2119_v22 = vld [vmem:[%s3292_s9 + $0x48] sm:$0xff] }
0x111e   :  { %v1707_v56 = vpop.f32.mrf.mxu3 }
0x111f   :  { %v1715_v20 = vsub.f32 %v3135_v3, %v1707_v56  ;;  %v2269_v56 = vld [vmem:[%s3298_s15] sm:$0xff] }
0x1121   :  { %v1721_v45 = vmul.f32 1.442695, %v1715_v20  ;;  %v2121_v20 = vld [vmem:[%s3292_s9 + $0x58] sm:$0xff] }
0x1126   :  { %v1710_v21 = vpop.f32.mrf.mxu3 }
0x1127   :  { %v1716_v42 = vsub.f32 %v3139_v38, %v1710_v21  ;;  %v2120_v21 = vld [vmem:[%s3292_s9 + $0x50] sm:$0xff]  ;;  %s2299_s9 = smov 32  }
0x1129   :  { %v1723_v48 = vmul.f32 1.442695, %v1716_v42 }
0x112b   :  { %2232 = vpow2.f32 %v1723_v48  ;;  %v2122_v48 = vld [vmem:[%s3293_s10 + $0x8] sm:$0xf] }
0x112c   :  { %2234 = vpow2.f32 %v1721_v45 }
0x112d   :  { %2236 = vpow2.f32 %v1719_v50 }
0x112e   :  { %2238 = vpow2.f32 %v1717_v51 }
0x1131   :  { %v2233_v52 = vpop.eup %2232 }
0x1132   :  { %1737 = vmatpush.msrb.mxu0 %v2233_v52  ;;  %v2235_v53 = vpop.eup %2234 }
0x1133   :  { %v2237_v3 = vpop.eup %2236 }
0x1134   :  { %1738 = vmatpush.msrb.mxu0 %v2235_v53  ;;  %v2239_v37 = vpop.eup %2238 }
0x1136   :  { %1739 = vmatpush.msrb.mxu0 %v2237_v3 }
0x1138   :  { %1740 = vmatpush.msrb.mxu0 %v2239_v37 }
0x1139   :  { %2149 = vmatmul.msk.f32.vlgmr.msrb.gmra.mxu0 %vm108_vm0, %v3196_v26 }
0x113a   :  { %2154 = vmatpush.msk.msra.mxu0 %vm539_vm14, %v2261_v14 }
0x11b6   :  { %v1742_v38 = vpop.f32.mrf.mxu0 }
0x11b7   :  { %1760 = vmatpush.msra.mxu1 %v1742_v38 }
0x11b8   :  { %2150 = vmatmul.msk.f32.vlgmr.msra.gmra.mxu1 %vm176_vm4, %v3098_v63 }
0x11b9   :  { %2162 = vmatpush.msk.msrb.mxu1 %vm301_vm2, %v2122_v48 }
0x11c0   :  { %2151 = vmatmul.msk.f32.gmra.mxu1 %vm176_vm4, %v3106_v39 }
0x11c8   :  { %2152 = vmatmul.msk.f32.gmra.mxu1 %vm176_vm4, %v3114_v40 }
0x11d0   :  { %2153 = vmatmul.msk.f32.gmra.mxu1 %vm176_vm4, %v3122_v41 }
0x1235   :  { %v1762_v55 = vpop.f32.mrf.mxu1 }
0x1236   :  { %v1763_v7 = vadd.f32 1e-16, %v1762_v55 }
0x1238   :  { %2240 = vrcp.f32 %v1763_v7 }
0x123d   :  { %v1765_v2 = vpop.f32.mrf.mxu1 }
0x123e   :  { %v2241_v8 = vpop.eup %2240  ;;  %v1766_v12 = vadd.f32 1e-16, %v1765_v2 }
0x123f   :  { %v1778_v54 = vmul.f32 %v2241_v8, %v2239_v37 }
0x1240   :  { %2242 = vrcp.f32 %v1766_v12 }
0x1241   :  { %2155 = vmatmul.msk.f32.vlgmr.msra.gmra.mxu0 %vm526_vm15, %v1778_v54  ;;  %v1870_v33 = vsel %vm526_vm15, %v1778_v54, 0.0 }
0x1245   :  { %v1768_v63 = vpop.f32.mrf.mxu1 }
0x1246   :  { %v2243_v57 = vpop.eup %2242  ;;  %v1769_v58 = vadd.f32 1e-16, %v1768_v63 }
0x1247   :  { %v1779_v39 = vmul.f32 %v2243_v57, %v2237_v3 }
0x1248   :  { %2244 = vrcp.f32 %v1769_v58 }
0x1249   :  { %2156 = vmatmul.msk.f32.gmra.mxu0 %vm526_vm15, %v1779_v39  ;;  %v1873_v40 = vsel %vm526_vm15, %v1779_v39, 0.0 }
0x124a   :  { %1874 = vadd.xlane.f32.xlu0 %v1873_v40 }
0x124d   :  { %v1771_v41 = vpop.f32.mrf.mxu1 }
0x124e   :  { %v2245_v59 = vpop.eup %2244  ;;  %v1772_v61 = vadd.f32 1e-16, %v1771_v41 }
0x124f   :  { %v1780_v62 = vmul.f32 %v2245_v59, %v2235_v53 }
0x1250   :  { %2246 = vrcp.f32 %v1772_v61 }
0x1251   :  { %2157 = vmatmul.msk.f32.gmra.mxu0 %vm526_vm15, %v1780_v62  ;;  %v1876_v5 = vsel %vm526_vm15, %v1780_v62, 0.0 }
0x1252   :  { %1877 = vadd.xlane.f32.xlu1 %v1876_v5 }
0x1256   :  { %v2247_v6 = vpop.eup %2246 }
0x1257   :  { %v1781_v32 = vmul.f32 %v2247_v6, %v2233_v52  ;;  %v2193_v52 = vld [vmem:[%s3294_s11 + $0x2] ss:$0 sm:$0xff] }
0x1259   :  { %2158 = vmatmul.msk.f32.gmra.mxu0 %vm526_vm15, %v1781_v32  ;;  %v1879_v16 = vsel %vm526_vm15, %v1781_v32, 0.0 }
0x125a   :  { %1880 = vadd.xlane.f32.xlu2 %v1879_v16 }
0x1262   :  { %1871 = vadd.xlane.f32.xlu2 %v1870_v33 }
0x12bd   :  { %v1875_v23 = vpop.xlane.xlu0 %1874 }
0x12be   :  { %v1811_v9 = vpop.f32.mrf.mxu0  ;;  %v1883_v35 = vmul.f32 0.5, %v1875_v23 }
0x12c0   :  { %v1887_v11 = vmul.f32 %v2947_v49, %v1883_v35  ;;  %v2262_v49 = vld [vmem:[%s3298_s15 + $0x38] sm:$0xff] }
0x12c5   :  { %v1878_v36 = vpop.xlane.xlu1 %1877 }
0x12c6   :  { %v1814_v10 = vpop.f32.mrf.mxu0  ;;  %v1884_v30 = vmul.f32 0.5, %v1878_v36 }
0x12c8   :  { %v1888_v18 = vmul.f32 %v2941_v46, %v1884_v30  ;;  %v1823_v46 = vmul.f32 %v1811_v9, %v3181_v17  ;;  %v2265_v17 = vld [vmem:[%s3298_s15 + $0x20] sm:$0xff] }
0x12cd   :  { %v1881_v24 = vpop.xlane.xlu2 %1880 }
0x12ce   :  { %v1885_v25 = vmul.f32 0.5, %v1881_v24  ;;  %v1817_v27 = vpop.f32.mrf.mxu0 }
0x12cf   :  { %v1825_v0 = vmul.f32 %v1817_v27, %v3185_v47  ;;  %v2266_v47 = vld [vmem:[%s3298_s15 + $0x18] sm:$0xff] }
0x12d0   :  { %v1889_v29 = vmul.f32 %v2935_v44, %v1885_v25  ;;  %v1824_v44 = vmul.f32 %v1814_v10, %v3183_v60  ;;  %v2264_v60 = vld [vmem:[%s3298_s15 + $0x28] sm:$0xff] }
0x12d2   :  { %1902 = vmatpush.msra.mxu3 %v1889_v29 }
0x12d4   :  { %1903 = vmatpush.msra.mxu3 %v1888_v18 }
0x12d5   :  { %v1872_v28 = vpop.xlane.xlu2 %1871 }
0x12d6   :  { %v1882_v31 = vmul.f32 0.5, %v1872_v28  ;;  %v1820_v13 = vpop.f32.mrf.mxu0  ;;  %1904 = vmatpush.msra.mxu3 %v1887_v11 }
0x12d7   :  { %v1826_v34 = vmul.f32 %v1820_v13, %v3187_v1  ;;  %v2267_v1 = vld [vmem:[%s3298_s15 + $0x10] sm:$0xff] }
0x12d8   :  { %v1886_v15 = vmul.f32 %v2954_v4, %v1882_v31  ;;  %v2263_v4 = vld [vmem:[%s3298_s15 + $0x30] sm:$0xff] }
0x12d9   :  { %1839 = vmatpush.msrb.mxu2 %v1826_v34 }
0x12da   :  { %1905 = vmatpush.msra.mxu3 %v1886_v15 }
0x12db   :  { %1840 = vmatpush.msrb.mxu2 %v1825_v0  ;;  %2161 = vmatmul.msk.f32.vlgmr.msra.gmra.mxu3 %vm108_vm0, %v3196_v26 }
0x12dd   :  { %1841 = vmatpush.msrb.mxu2 %v1824_v44 }
0x12df   :  { %1842 = vmatpush.msrb.mxu2 %v1823_v46 }
0x12e0   :  { %2159 = vmatmul.msk.f32.vlgmr.msrb.gmra.mxu2 %vm108_vm0, %v3196_v26 }
0x12e1   :  { %1858 = vmatpush.msra.mxu2 %v2262_v49 }
0x12e3   :  { %1859 = vmatpush.msra.mxu2 %v2263_v4 }
0x12e5   :  { %1860 = vmatpush.msra.mxu2 %v2264_v60 }
0x12e7   :  { %1861 = vmatpush.msra.mxu2 %v2265_v17 }
0x12e9   :  { %1862 = vmatpush.msra.mxu2 %v2266_v47 }
0x12eb   :  { %1863 = vmatpush.msra.mxu2 %v2267_v1 }
0x12ed   :  { %1864 = vmatpush.msra.mxu2 %v2268_v19 }
0x12ef   :  { %1865 = vmatpush.msra.mxu2 %v2269_v56 }
0x12f1   :  { %1951 = vmatpush.msrb.mxu2 %v2121_v20 }
0x12f3   :  { %1952 = vmatpush.msrb.mxu2 %v2120_v21 }
0x12f5   :  { %1953 = vmatpush.msrb.mxu2 %v2119_v22 }
0x12f7   :  { %1954 = vmatpush.msrb.mxu2 %v2118_v43 }
0x135e   :  { %v1907_v45 = vpop.f32.mrf.mxu3 }
0x135f   :  { %2163 = vmatmul.msk.f32.vlgmr.msrb.gmra.mxu1 %vm288_vm3, %v1907_v45 }
0x1363   :  { %v1844_v42 = vpop.f32.mrf.mxu2 }
0x1364   :  { %2160 = vmatmul.msk.f32.vlgmr.msra.gmra.mxu2 %vm132_vm1, %v1844_v42 }
0x13dc   :  { %v1933_v51 = vpop.f32.mrf.mxu1 }
0x13e7   :  { %v1867_v50 = vpop.f32.mrf.mxu2 }
0x13e8   :  { %2164 = vmatmul.msk.f32.vlgmr.msrb.gmra.mxu2 %vm108_vm0, %v1867_v50 }
0x146b   :  { %v1956_v53 = vpop.f32.mrf.mxu2 }
0x146c   :  { %v1957_v3 = vadd.f32 %v1956_v53, %v1933_v51 }
0x146e   :  { %v1962_v37 = vadd.f32 %v2193_v52, %v1957_v3 }
0x1470   :  { %1965 = vrot.lane.b32.xlu1 %v1962_v37, %s2299_s9  ;;  %v1963_v26 = vmax.f32 %v1962_v37, 0.0 }
0x14e2   :  { %v1966_v14 = vpop.permute.xlu1 %1965 }
0x14e3   :  { %v1968_v38 = vsel %vm108_vm0, %v1963_v26, %v1966_v14 }
0x14e4   :  { %1969 = vst.msk [vmem:[#allocation2] sm:$0xff] %vm132_vm1, %v1968_v38 }
0x14e5   :  { %1980 = dma.vmem_to_hbm [thread:$0]  %s1976_s29, 128, %s1978_s12, [#allocation3]  }
0x14e6   :  { %2294 = dma.done.wait [#allocation3], 128  }
0x14e7   :  { %2295 = vsyncadd [#allocation3], 4294967168 }
0x14e8   :  { %1985 = vsyncpa [#allocation3], 1 }

</bundles_post_ra>
